<compile_context>
chip_gen: v7x
topology: tpu7x:2x2x1
jax: 0.10.0
libtpu: 0.0.40
codegen_flags: <defaults>
</compile_context>

<pallas_src>
import jax
import jax.numpy as jnp
from jax.experimental import pallas as pl
from jax.experimental.pallas import tpu as pltpu

LANE = 128


def dqn_kernel(x_ref, w1_ref, b1_ref, w2_ref, b2_ref, w3_ref, b3_ref, o_ref):
    # fc1 + relu: bf16 MXU inputs, f32 accumulation, f32 elementwise.
    x = x_ref[...].astype(jnp.bfloat16)          # no-op when x is already bf16
    h1 = jnp.dot(x, w1_ref[...], preferred_element_type=jnp.float32)
    h1 = jnp.maximum(h1 + b1_ref[...], 0.0)
    # fc2 + relu
    h2 = jnp.dot(h1.astype(jnp.bfloat16), w2_ref[...],
                 preferred_element_type=jnp.float32)
    h2 = jnp.maximum(h2 + b2_ref[...], 0.0)
    # out (no activation), lane-dense 128-wide store.
    o = jnp.dot(h2.astype(jnp.bfloat16), w3_ref[...],
                preferred_element_type=jnp.float32)
    o_ref[...] = o + b3_ref[...]


def dqn_forward(x, params, out_dim, *, tile_b=512):
    """Fused 3-layer MLP forward.

    x: (B, input_dim), float32 or bfloat16 (bf16 preferred: halves x DMA).
    params: (w1, b1, w2, b2, w3_padded, b3_padded) from init_params.
    Returns (B, out_dim) float32 Q-values.
    """
    w1, b1, w2, b2, w3, b3 = params
    batch, input_dim = x.shape
    out_pad = w3.shape[1]                      # lane-dense (128-wide) output

    # Batch tile: as large as possible (amortize ~0.35 us/step overhead), but
    # never larger than the array; split into >=2 grid steps when the batch is
    # big enough so v7x's two TensorCores both get grid steps.  (v5e: keep
    # tile_b <= 512 to avoid f32-intermediate spills on its single vst slot.)
    tile = min(tile_b, batch)
    if tile >= 512 and pl.cdiv(batch, tile) < 2:
        tile = pl.cdiv(pl.cdiv(batch, 2), 8) * 8
    grid = (pl.cdiv(batch, tile),)

    def resident(arr):
        # Constant block index -> loaded once, stays resident in VMEM.
        return pl.BlockSpec(arr.shape, lambda i: (0, 0))

    out = pl.pallas_call(
        dqn_kernel,
        out_shape=jax.ShapeDtypeStruct((batch, out_pad), jnp.float32),
        grid=grid,
        in_specs=[
            pl.BlockSpec((tile, input_dim), lambda i: (i, 0)),   # x tile
            resident(w1), resident(b1),
            resident(w2), resident(b2),
            resident(w3), resident(b3),
        ],
        out_specs=pl.BlockSpec((tile, out_pad), lambda i: (i, 0)),
        compiler_params=pltpu.CompilerParams(
            dimension_semantics=("parallel",)),
    )(x, w1, b1, w2, b2, w3, b3)

    return out[:, :out_dim]


def init_params(key, input_dim, output_dim, hidden_dims=(128, 128)):
    """Deterministic init mirroring nn.Linear shapes (stored transposed).

    Weights in bfloat16 (MXU-native), biases in float32.  The last layer's
    weight/bias are zero-padded to 128 output lanes for lane-dense stores.
    """
    dims = [input_dim, hidden_dims[0], hidden_dims[1], output_dim]
    out_pad = max(LANE, pl.cdiv(output_dim, LANE) * LANE)
    params = []
    for i in range(3):
        key, kw, kb = jax.random.split(key, 3)
        fan_in = dims[i]
        bound = fan_in ** -0.5
        w = jax.random.uniform(kw, (dims[i], dims[i + 1]), jnp.float32,
                               minval=-bound, maxval=bound)
        b = jax.random.uniform(kb, (1, dims[i + 1]), jnp.float32,
                               minval=-bound, maxval=bound)
        if i == 2 and dims[i + 1] != out_pad:
            w = jnp.pad(w, ((0, 0), (0, out_pad - dims[i + 1])))
            b = jnp.pad(b, ((0, 0), (0, out_pad - dims[i + 1])))
        params.extend([w.astype(jnp.bfloat16), b])
    return tuple(params)


def reference_forward(x, params, out_dim):
    """Pure-JAX reference using the same bf16-input / f32-accumulate scheme."""
    w1, b1, w2, b2, w3, b3 = params
    xb = x.astype(jnp.bfloat16)
    h1 = jnp.maximum(jnp.dot(xb, w1, preferred_element_type=jnp.float32) + b1, 0.0)
    h2 = jnp.maximum(jnp.dot(h1.astype(jnp.bfloat16), w2,
                             preferred_element_type=jnp.float32) + b2, 0.0)
    o = jnp.dot(h2.astype(jnp.bfloat16), w3,
                preferred_element_type=jnp.float32) + b3
    return o[:, :out_dim]


if __name__ == "__main__":
    batch = 640          # 2 grid steps at tile_b=512, ragged last block
    input_dim = 32
    output_dim = 8
    hidden_dims = (128, 128)

    key = jax.random.PRNGKey(0)
    key, kx = jax.random.split(key)
    # bf16 activations end-to-end (replay-buffer dtype): halves x DMA traffic.
    x = jax.random.normal(kx, (batch, input_dim), jnp.float32).astype(jnp.bfloat16)
    params = init_params(key, input_dim, output_dim, hidden_dims)

    out = jax.block_until_ready(dqn_forward(x, params, output_dim))
    ref = reference_forward(x, params, output_dim)
    assert out.shape == (batch, output_dim)
    assert jnp.allclose(out, ref, atol=1e-2, rtol=1e-2), "mismatch vs reference"

    # Small / odd batch exercises the full-array single-block path.
    out_small = jax.block_until_ready(dqn_forward(x[:5], params, output_dim))
    assert out_small.shape == (5, output_dim)
    assert jnp.allclose(out_small, ref[:5], atol=1e-2, rtol=1e-2)

    print("KERNEL_OK")
</pallas_src>

<mosaic_0001>
module attributes {stable_mosaic.version = 11 : i64} {
  func.func @dqn_kernel(%arg0: i32, %arg1: memref<512x32xbf16, #tpu.memory_space<vmem>>, %arg2: memref<32x128xbf16, #tpu.memory_space<vmem>>, %arg3: memref<1x128xf32, #tpu.memory_space<vmem>>, %arg4: memref<128x128xbf16, #tpu.memory_space<vmem>>, %arg5: memref<1x128xf32, #tpu.memory_space<vmem>>, %arg6: memref<128x128xbf16, #tpu.memory_space<vmem>>, %arg7: memref<1x128xf32, #tpu.memory_space<vmem>>, %arg8: memref<512x128xf32, #tpu.memory_space<vmem>>) attributes {dimension_semantics = [#tpu.dimension_semantics<parallel>], iteration_bounds = array<i64: 2>, scalar_prefetch = 0 : i64, scratch_operands = 0 : i64, tpu.core_type = #tpu.core_type<tc>, window_params = [{transform_indices = @transform_0, window_bounds = array<i64: 512, 32>}, {pipeline_mode = #tpu.pipeline_mode<synchronous>, transform_indices = @transform_1, window_bounds = array<i64: 32, 128>}, {pipeline_mode = #tpu.pipeline_mode<synchronous>, transform_indices = @transform_2, window_bounds = array<i64: 1, 128>}, {pipeline_mode = #tpu.pipeline_mode<synchronous>, transform_indices = @transform_3, window_bounds = array<i64: 128, 128>}, {pipeline_mode = #tpu.pipeline_mode<synchronous>, transform_indices = @transform_4, window_bounds = array<i64: 1, 128>}, {pipeline_mode = #tpu.pipeline_mode<synchronous>, transform_indices = @transform_5, window_bounds = array<i64: 128, 128>}, {pipeline_mode = #tpu.pipeline_mode<synchronous>, transform_indices = @transform_6, window_bounds = array<i64: 1, 128>}, {transform_indices = @transform_7, window_bounds = array<i64: 512, 128>}]} {
    %c0 = arith.constant 0 : index
    %c0_0 = arith.constant 0 : index
    %0 = vector.load %arg1[%c0, %c0_0] : memref<512x32xbf16, #tpu.memory_space<vmem>>, vector<512x32xbf16>
    %c0_1 = arith.constant 0 : index
    %c0_2 = arith.constant 0 : index
    %1 = vector.load %arg2[%c0_1, %c0_2] : memref<32x128xbf16, #tpu.memory_space<vmem>>, vector<32x128xbf16>
    %cst = arith.constant dense<0.000000e+00> : vector<512x128xf32>
    %2 = tpu.matmul %0, %1, %cst {dimension_numbers = #tpu.dot_dimension_numbers<[1], [0], [0], [1], [0, 0, 1, 1], [], []>} : vector<512x32xbf16>, vector<32x128xbf16>, vector<512x128xf32> -> vector<512x128xf32>
    %c0_3 = arith.constant 0 : index
    %c0_4 = arith.constant 0 : index
    %3 = vector.load %arg3[%c0_3, %c0_4] : memref<1x128xf32, #tpu.memory_space<vmem>>, vector<1x128xf32>
    %4 = vector.broadcast %3 : vector<1x128xf32> to vector<512x128xf32>
    %5 = arith.addf %2, %4 : vector<512x128xf32>
    %cst_5 = arith.constant 0.000000e+00 : f32
    %6 = vector.broadcast %cst_5 : f32 to vector<512x128xf32>
    %7 = arith.maximumf %5, %6 : vector<512x128xf32>
    %8 = arith.truncf %7 : vector<512x128xf32> to vector<512x128xbf16>
    %c0_6 = arith.constant 0 : index
    %c0_7 = arith.constant 0 : index
    %9 = vector.load %arg4[%c0_6, %c0_7] : memref<128x128xbf16, #tpu.memory_space<vmem>>, vector<128x128xbf16>
    %cst_8 = arith.constant dense<0.000000e+00> : vector<512x128xf32>
    %10 = tpu.matmul %8, %9, %cst_8 {dimension_numbers = #tpu.dot_dimension_numbers<[1], [0], [0], [1], [0, 0, 1, 1], [], []>} : vector<512x128xbf16>, vector<128x128xbf16>, vector<512x128xf32> -> vector<512x128xf32>
    %c0_9 = arith.constant 0 : index
    %c0_10 = arith.constant 0 : index
    %11 = vector.load %arg5[%c0_9, %c0_10] : memref<1x128xf32, #tpu.memory_space<vmem>>, vector<1x128xf32>
    %12 = vector.broadcast %11 : vector<1x128xf32> to vector<512x128xf32>
    %13 = arith.addf %10, %12 : vector<512x128xf32>
    %cst_11 = arith.constant 0.000000e+00 : f32
    %14 = vector.broadcast %cst_11 : f32 to vector<512x128xf32>
    %15 = arith.maximumf %13, %14 : vector<512x128xf32>
    %16 = arith.truncf %15 : vector<512x128xf32> to vector<512x128xbf16>
    %c0_12 = arith.constant 0 : index
    %c0_13 = arith.constant 0 : index
    %17 = vector.load %arg6[%c0_12, %c0_13] : memref<128x128xbf16, #tpu.memory_space<vmem>>, vector<128x128xbf16>
    %cst_14 = arith.constant dense<0.000000e+00> : vector<512x128xf32>
    %18 = tpu.matmul %16, %17, %cst_14 {dimension_numbers = #tpu.dot_dimension_numbers<[1], [0], [0], [1], [0, 0, 1, 1], [], []>} : vector<512x128xbf16>, vector<128x128xbf16>, vector<512x128xf32> -> vector<512x128xf32>
    %c0_15 = arith.constant 0 : index
    %c0_16 = arith.constant 0 : index
    %19 = vector.load %arg7[%c0_15, %c0_16] : memref<1x128xf32, #tpu.memory_space<vmem>>, vector<1x128xf32>
    %20 = vector.broadcast %19 : vector<1x128xf32> to vector<512x128xf32>
    %21 = arith.addf %18, %20 : vector<512x128xf32>
    %c0_17 = arith.constant 0 : index
    %c0_18 = arith.constant 0 : index
    %22 = vector.load %arg8[%c0_17, %c0_18] : memref<512x128xf32, #tpu.memory_space<vmem>>, vector<512x128xf32>
    tpu.vector_store %arg8[%c0_17, %c0_18], %21 {strides = array<i32>} : memref<512x128xf32, #tpu.memory_space<vmem>>, vector<512x128xf32>,
    return
  }
  func.func @transform_0(%arg0: i32) -> (i32, i32) {
    %c0_i32 = arith.constant 0 : i32
    %c0_i32_0 = arith.constant 0 : i32
    return %arg0, %c0_i32 : i32, i32
  }
  func.func @transform_1(%arg0: i32) -> (i32, i32) {
    %c0_i32 = arith.constant 0 : i32
    %c0_i32_0 = arith.constant 0 : i32
    %c0_i32_1 = arith.constant 0 : i32
    return %c0_i32, %c0_i32_0 : i32, i32
  }
  func.func @transform_2(%arg0: i32) -> (i32, i32) {
    %c0_i32 = arith.constant 0 : i32
    %c0_i32_0 = arith.constant 0 : i32
    %c0_i32_1 = arith.constant 0 : i32
    return %c0_i32, %c0_i32_0 : i32, i32
  }
  func.func @transform_3(%arg0: i32) -> (i32, i32) {
    %c0_i32 = arith.constant 0 : i32
    %c0_i32_0 = arith.constant 0 : i32
    %c0_i32_1 = arith.constant 0 : i32
    return %c0_i32, %c0_i32_0 : i32, i32
  }
  func.func @transform_4(%arg0: i32) -> (i32, i32) {
    %c0_i32 = arith.constant 0 : i32
    %c0_i32_0 = arith.constant 0 : i32
    %c0_i32_1 = arith.constant 0 : i32
    return %c0_i32, %c0_i32_0 : i32, i32
  }
  func.func @transform_5(%arg0: i32) -> (i32, i32) {
    %c0_i32 = arith.constant 0 : i32
    %c0_i32_0 = arith.constant 0 : i32
    %c0_i32_1 = arith.constant 0 : i32
    return %c0_i32, %c0_i32_0 : i32, i32
  }
  func.func @transform_6(%arg0: i32) -> (i32, i32) {
    %c0_i32 = arith.constant 0 : i32
    %c0_i32_0 = arith.constant 0 : i32
    %c0_i32_1 = arith.constant 0 : i32
    return %c0_i32, %c0_i32_0 : i32, i32
  }
  func.func @transform_7(%arg0: i32) -> (i32, i32) {
    %c0_i32 = arith.constant 0 : i32
    %c0_i32_0 = arith.constant 0 : i32
    return %arg0, %c0_i32 : i32, i32
  }
}

</mosaic_0001>

<bundles_post_ra>
// kernel: tpu_custom_call.1
= control target key start
LH: loop header
LB: loop body
LE: loop exit
PB: predicated region body
PF: predicated region fallthrough
CT: control target
= control target key end

     0   :  { %12 = vsyncpa [#allocation3], 0  ;;  %s3186_s0 = inlined_call_operand.vmem [shape: bf16[640,32], index: 0, kind: input, shape index: {}]   ;;  %s3187_s1 = inlined_call_operand.vmem [shape: bf16[32,128], index: 1, kind: input, shape index: {}]   ;;  %s3188_s2 = inlined_call_operand.vmem [shape: f32[1,128], index: 2, kind: input, shape index: {}]   ;;  %s3189_s3 = inlined_call_operand.vmem [shape: bf16[128,128], index: 3, kind: input, shape index: {}]   ;;  %s3190_s4 = inlined_call_operand.vmem [shape: f32[1,128], index: 4, kind: input, shape index: {}]   ;;  %s3191_s5 = inlined_call_operand.vmem [shape: bf16[128,128], index: 5, kind: input, shape index: {}]   ;;  %s3192_s6 = inlined_call_operand.vmem [shape: f32[1,128], index: 6, kind: input, shape index: {}]   ;;  %s3193_s7 = inlined_call_operand.hbm [shape: f32[640,128], index: 7, kind: output, shape index: {}]  }
   0x1   :  { %14 = vsyncpa [#allocation3 + $0x1], 0  ;;  %s2641_s24 = smov 0   ;;  %s2643_s25 = smov 0  }
   0x2   :  { %s2645_s26 = smov 0   ;;  %s2647_s27 = smov 0  }
   0x3 LB: > { %s2662_s28 = sadd.s32 4294967295, %s2596_s27   ;;  %s1996_s29 = sadd.s32 4294967294, %s2596_s27   ;;  %s2596_s27 = sphi %s2647_s27, %s3199_s27   ;;  %s2592_s26 = sphi %s2645_s26, %s3198_s26   ;;  %s2588_s25 = sphi %s2643_s25, %s3197_s25   ;;  %s2584_s24 = sphi %s2641_s24, %s3196_s24  }
   0x4   : > { %s2666_s30 = sadd.s32 1, %s2596_s27   ;;  %s179_s8 = sadd.s32 1, %s2592_s26 }
   0x5   : > { %s176_s9 = ssub.s32 %s2596_s27, %s2666_s30  ;;  %p189_p0 = scmp.ne.s32.totalorder %s2592_s26, %s2588_s25 }
   0x6   : > { %p177_p1 = scmp.eq.s32.totalorder %s176_s9, 0  ;;  %p190_p2 = scmp.eq.s32.totalorder %s2662_s28, 1 }
   0x7   : > { %p195_p3 = scmp.ne.s32.totalorder %s2588_s25, %s2584_s24  ;;  %p196_p4 = scmp.eq.s32.totalorder %s1996_s29, 1 }
   0x8   : > { %s2677_s10 = scalar_select %p177_p1, %s2592_s26, %s179_s8  }
   0x9   : > { %p2679_p5 = por %p190_p2, %p189_p0  ;;  %p2683_p6 = por %p196_p4, %p195_p3 }
   0xa   : > { %p1999_p7 = scmp.ge.s32.totalorder %s2596_s27, 1  ;;  %p249_p8 = scmp.lt.s32.totalorder %s2596_s27, 3 }
   0xc   : > { %p250_p9 = pnand %p1999_p7, %p249_p8 }
   0xd   : > { %v2484_v0 = vld [vmem:[%s3187_s1] sm:$0xff] (!%p250_p9)   ;;  %s2693_s15 = sshll.u32 (!%p250_p9), %s2662_s28, 6  ;;  %v2485_v1 = vld [vmem:[%s3187_s1 + $0x8] sm:$0xff] (!%p250_p9)   ;;  %vm552_vm0 = vcmask (!%p250_p9), 261120   ;;  %v2520_v14 = vld [vmem:[%s3189_s3 + $0x10] sm:$0xff] (!%p250_p9)   ;;  %s282_s20 = sand.u32 (!%p250_p9), 1, %s2588_s25  }
   0xe   : > { %253 = sbr.rel (%p250_p9) target bundleno = 837 (0x345), region = 48  ;;  %p290_p10 = scmp.lt.s32.totalorder (!%p250_p9), %s2693_s15, 79  ;;  %2212 = vmatprep.subr.bf16.mxu0 (!%p250_p9), %v2484_v0  ;;  %2440 = vmatprep.subr.bf16.mxu1 (!%p250_p9), %v2484_v0  ;;  %v2518_v2 = vld [vmem:[%s3189_s3] sm:$0xff] (!%p250_p9)   ;;  %v2519_v11 = vld [vmem:[%s3189_s3 + $0x8] sm:$0xff] (!%p250_p9)   ;;  %v2521_v19 = vld [vmem:[%s3189_s3 + $0x18] sm:$0xff] (!%p250_p9)  }
   0xf   : > { %2213 = vmatpush3.bf16.msra.mxu0 (!%p250_p9), %v2484_v0  ;;  %2442 = vmatpush3.bf16.msra.mxu1 (!%p250_p9), %v2484_v0  ;;  %v2522_v20 = vld [vmem:[%s3189_s3 + $0x20] sm:$0xff] (!%p250_p9)   ;;  %v2523_v25 = vld [vmem:[%s3189_s3 + $0x28] sm:$0xff] (!%p250_p9)   ;;  %v2524_v26 = vld [vmem:[%s3189_s3 + $0x30] sm:$0xff] (!%p250_p9)   ;;  %s3125_s9 = scalar_lea.sflag (!%p250_p9), [#allocation3], %s282_s20 }
  0x10   : > { %2214 = vmatprep.subr.bf16.mxu0 (!%p250_p9), %v2485_v1  ;;  %2441 = vmatprep.subr.bf16.mxu1 (!%p250_p9), %v2485_v1  ;;  %v2525_v41 = vld [vmem:[%s3189_s3 + $0x38] sm:$0xff] (!%p250_p9)   ;;  %v2796_v42 = vld [vmem:[%s3188_s2] ss:$0 sm:$0xff] (!%p250_p9)  ;;  %v2527_v51 = vld [vmem:[%s3191_s5 + $0x8] sm:$0xff] (!%p250_p9)  }
  0x11   : > { %v2526_v50 = vld [vmem:[%s3191_s5] sm:$0xff] (!%p250_p9)   ;;  %v2528_v58 = vld [vmem:[%s3191_s5 + $0x10] sm:$0xff] (!%p250_p9)  }
  0x13   : > { %2215 = vmatpush3.bf16.msra.mxu0 (!%p250_p9), %v2485_v1  ;;  %2443 = vmatpush3.bf16.msra.mxu1 (!%p250_p9), %v2485_v1 }
  0x14   : > { %2280 = vmatprep.subr.bf16.mxu1 (!%p250_p9), %v2518_v2  ;;  %2360 = vmatprep.subr.bf16.mxu0 (!%p250_p9), %v2526_v50 }
  0x15   : > { %s291_s18 = scalar_select %p290_p10, %s2693_s15, 79 }
  0x16   : > { %s1923_s13 = ssub.s32 (%p2679_p5), 80, %s2693_s15 }
  0x17   : > { %s2002_s21 = sshll.u32 %s291_s18, 2  ;;  %p1924_p11 = scmp.lt.s32.totalorder (%p2679_p5), %s1923_s13, 64 }
  0x18   : > { %s2706_s29 = scalar_lea.vmem %s3186_s0, %s2002_s21  ;;  %s2000_s21 = sshll.u32 %s282_s20, 9 }
  0x19   : > { %v2486_v3 = vld [vmem:[%s2706_s29] sm:$0xff]   ;;  %v2487_v4 = vld [vmem:[%s2706_s29 + $0x8] sm:$0xff]   ;;  %v2488_v5 = vld [vmem:[%s2706_s29 + $0x10] sm:$0xff]   ;;  %s2995_s8 = scalar_lea.vmem [#allocation2], %s2000_s21 }
  0x1a   : > { %2216 = vmatprep.mubr.msk.bf16.mxu0 %vm552_vm0, %v2486_v3  ;;  %v2489_v6 = vld [vmem:[%s2706_s29 + $0x18] sm:$0xff]   ;;  %v2490_v7 = vld [vmem:[%s2706_s29 + $0x20] sm:$0xff]   ;;  %v2491_v8 = vld [vmem:[%s2706_s29 + $0x28] sm:$0xff]  }
  0x1b   : > { %2217 = vmatmul.mubr.msk.bf16.vlgmr.msra.gmra.mrb[0].mxu0 %vm552_vm0, %v2487_v4  ;;  %v2492_v9 = vld [vmem:[%s2706_s29 + $0x30] sm:$0xff]   ;;  %v2502_v10 = vld [vmem:[%s2706_s29 + $0x80] sm:$0xff]   ;;  %v2503_v12 = vld [vmem:[%s2706_s29 + $0x88] sm:$0xff]  }
  0x1c   : > { %2220 = vmatprep.mubr.msk.bf16.mxu0 %vm552_vm0, %v2488_v5  ;;  %2248 = vmatprep.mubr.msk.bf16.mxu1 %vm552_vm0, %v2502_v10  ;;  %v2504_v13 = vld [vmem:[%s2706_s29 + $0x90] sm:$0xff]   ;;  %v2493_v15 = vld [vmem:[%s2706_s29 + $0x38] sm:$0xff]   ;;  %v2494_v16 = vld [vmem:[%s2706_s29 + $0x40] sm:$0xff]  }
  0x1d   : > { %2249 = vmatmul.mubr.msk.bf16.vlgmr.msra.gmra.mrb[0].mxu1 %vm552_vm0, %v2503_v12  ;;  %v2505_v17 = vld [vmem:[%s2706_s29 + $0x98] sm:$0xff]   ;;  %v2506_v18 = vld [vmem:[%s2706_s29 + $0xa0] sm:$0xff]   ;;  %v2495_v21 = vld [vmem:[%s2706_s29 + $0x48] sm:$0xff]   ;;  %2361 = vmatpush3.bf16.msra.mxu0 %v2526_v50 }
  0x1e   : > { %2252 = vmatprep.mubr.msk.bf16.mxu1 %vm552_vm0, %v2504_v13  ;;  %2281 = vmatpush3.bf16.msra.mxu1 %v2518_v2  ;;  %v2496_v22 = vld [vmem:[%s2706_s29 + $0x50] sm:$0xff]   ;;  %v2507_v23 = vld [vmem:[%s2706_s29 + $0xa8] sm:$0xff]   ;;  %v2497_v27 = vld [vmem:[%s2706_s29 + $0x58] sm:$0xff]  }
  0x1f   : > { %2282 = vmatprep.subr.bf16.mxu1 %v2519_v11  ;;  %v2508_v24 = vld [vmem:[%s2706_s29 + $0xb0] sm:$0xff]   ;;  %v2509_v28 = vld [vmem:[%s2706_s29 + $0xb8] sm:$0xff]   ;;  %v2498_v29 = vld [vmem:[%s2706_s29 + $0x60] sm:$0xff]   ;;  %2362 = vmatprep.subr.bf16.mxu0 %v2527_v51 }
  0x20   : > { %v2510_v30 = vld [vmem:[%s2706_s29 + $0xc0] sm:$0xff]   ;;  %v2499_v31 = vld [vmem:[%s2706_s29 + $0x68] sm:$0xff]   ;;  %v2500_v33 = vld [vmem:[%s2706_s29 + $0x70] sm:$0xff]  }
  0x21   : > { %v2511_v32 = vld [vmem:[%s2706_s29 + $0xc8] sm:$0xff]   ;;  %v2512_v34 = vld [vmem:[%s2706_s29 + $0xd0] sm:$0xff]   ;;  %v2501_v35 = vld [vmem:[%s2706_s29 + $0x78] sm:$0xff]   ;;  %2363 = vmatpush3.bf16.msra.mxu0 %v2527_v51 }
  0x22   : > { %2283 = vmatpush3.bf16.msra.mxu1 %v2519_v11  ;;  %v2513_v36 = vld [vmem:[%s2706_s29 + $0xd8] sm:$0xff]   ;;  %v2514_v37 = vld [vmem:[%s2706_s29 + $0xe0] sm:$0xff]   ;;  %v2515_v38 = vld [vmem:[%s2706_s29 + $0xe8] sm:$0xff]   ;;  %2364 = vmatprep.subr.bf16.mxu0 %v2528_v58 }
  0x23   : > { %2221 = vmatmul.mubr.msk.bf16.gmra.mrb[4].mxu0 %vm552_vm0, %v2489_v6  ;;  %2284 = vmatprep.subr.bf16.mxu1 %v2520_v14  ;;  %v2516_v39 = vld [vmem:[%s2706_s29 + $0xf0] sm:$0xff]   ;;  %v2517_v40 = vld [vmem:[%s2706_s29 + $0xf8] sm:$0xff]   ;;  %v2530_v10 = vld [vmem:[%s3191_s5 + $0x20] sm:$0xff]  }
  0x24   : > { %2224 = vmatprep.mubr.msk.bf16.mxu0 %vm552_vm0, %v2490_v7  ;;  %v2529_v3 = vld [vmem:[%s3191_s5 + $0x18] sm:$0xff]  }
  0x25   : > { %2253 = vmatmul.mubr.msk.bf16.gmra.mrb[4].mxu1 %vm552_vm0, %v2505_v17  ;;  %2365 = vmatpush3.bf16.msra.mxu0 %v2528_v58 }
  0x26   : > { %2256 = vmatprep.mubr.msk.bf16.mxu1 %vm552_vm0, %v2506_v18  ;;  %2285 = vmatpush3.bf16.msra.mxu1 %v2520_v14 }
  0x27   : > { %2286 = vmatprep.subr.bf16.mxu1 %v2521_v19  ;;  %2366 = vmatprep.subr.bf16.mxu0 %v2529_v3 }
  0x29   : > { %2367 = vmatpush3.bf16.msra.mxu0 %v2529_v3 }
  0x2a   : > { %2287 = vmatpush3.bf16.msra.mxu1 %v2521_v19  ;;  %2368 = vmatprep.subr.bf16.mxu0 %v2530_v10 }
  0x2b   : > { %2225 = vmatmul.mubr.msk.bf16.gmra.mrb[8].mxu0 %vm552_vm0, %v2491_v8  ;;  %2288 = vmatprep.subr.bf16.mxu1 %v2522_v20 }
  0x2c   : > { %2228 = vmatprep.mubr.msk.bf16.mxu0 %vm552_vm0, %v2492_v9 }
  0x2d   : > { %2257 = vmatmul.mubr.msk.bf16.gmra.mrb[8].mxu1 %vm552_vm0, %v2507_v23  ;;  %2369 = vmatpush3.bf16.msra.mxu0 %v2530_v10 }
  0x2e   : > { %2260 = vmatprep.mubr.msk.bf16.mxu1 %vm552_vm0, %v2508_v24  ;;  %2289 = vmatpush3.bf16.msra.mxu1 %v2522_v20 }
  0x2f   : > { %2290 = vmatprep.subr.bf16.mxu1 %v2523_v25 }
  0x32   : > { %2291 = vmatpush3.bf16.msra.mxu1 %v2523_v25 }
  0x33   : > { %2229 = vmatmul.mubr.msk.bf16.gmra.mrb[12].mxu0 %vm552_vm0, %v2493_v15  ;;  %2292 = vmatprep.subr.bf16.mxu1 %v2524_v26 }
  0x34   : > { %2232 = vmatprep.mubr.msk.bf16.mxu0 %vm552_vm0, %v2494_v16 }
  0x35   : > { %2261 = vmatmul.mubr.msk.bf16.gmra.mrb[12].mxu1 %vm552_vm0, %v2509_v28 }
  0x36   : > { %2264 = vmatprep.mubr.msk.bf16.mxu1 %vm552_vm0, %v2510_v30  ;;  %2293 = vmatpush3.bf16.msra.mxu1 %v2524_v26 }
  0x37   : > { %2294 = vmatprep.subr.bf16.mxu1 %v2525_v41 }
  0x3a   : > { %2295 = vmatpush3.bf16.msra.mxu1 %v2525_v41 }
  0x3b   : > { %2233 = vmatmul.mubr.msk.bf16.gmra.mrb[16].mxu0 %vm552_vm0, %v2495_v21 }
  0x3c   : > { %2236 = vmatprep.mubr.msk.bf16.mxu0 %vm552_vm0, %v2496_v22 }
  0x3d   : > { %2265 = vmatmul.mubr.msk.bf16.gmra.mrb[16].mxu1 %vm552_vm0, %v2511_v32 }
  0x3e   : > { %2268 = vmatprep.mubr.msk.bf16.mxu1 %vm552_vm0, %v2512_v34 }
  0x43   : > { %2237 = vmatmul.mubr.msk.bf16.gmra.mrb[20].mxu0 %vm552_vm0, %v2497_v27  ;;  %v2531_v27 = vld [vmem:[%s3191_s5 + $0x28] sm:$0xff]  }
  0x44   : > { %2240 = vmatprep.mubr.msk.bf16.mxu0 %vm552_vm0, %v2498_v29  ;;  %2370 = vmatprep.subr.bf16.mxu0 %v2531_v27 }
  0x45   : > { %2269 = vmatmul.mubr.msk.bf16.gmra.mrb[20].mxu1 %vm552_vm0, %v2513_v36  ;;  %2371 = vmatpush3.bf16.msra.mxu0 %v2531_v27 }
  0x46   : > { %2272 = vmatprep.mubr.msk.bf16.mxu1 %vm552_vm0, %v2514_v37 }
  0x4b   : > { %2241 = vmatmul.mubr.msk.bf16.gmra.mrb[24].mxu0 %vm552_vm0, %v2499_v31 }
  0x4c   : > { %2244 = vmatprep.mubr.msk.bf16.mxu0 %vm552_vm0, %v2500_v33 }
  0x4d   : > { %2273 = vmatmul.mubr.msk.bf16.gmra.mrb[24].mxu1 %vm552_vm0, %v2515_v38 }
  0x4e   : > { %2276 = vmatprep.mubr.msk.bf16.mxu1 %vm552_vm0, %v2516_v39  ;;  %v2532_v39 = vld [vmem:[%s3191_s5 + $0x30] sm:$0xff]  }
  0x4f   : > { %2372 = vmatprep.subr.bf16.mxu0 %v2532_v39 }
  0x50   : > { %2373 = vmatpush3.bf16.msra.mxu0 %v2532_v39 }
  0x53   : > { %2245 = vmatmul.mubr.msk.bf16.gmra.mrb[28].mxu0 %vm552_vm0, %v2501_v35 }
  0x55   : > { %2277 = vmatmul.mubr.msk.bf16.gmra.mrb[28].mxu1 %vm552_vm0, %v2517_v40 }
  0xee   : > { %v2218_v43 = vpop.f32.mrb[0].mxu0 }
  0xef   : > { %v692_v44 = vadd.f32 %v2218_v43, %v2796_v42  ;;  %v683_v45 = vpop.f32.mrb[1].mxu0 }
  0xf0   : > { %v684_v46 = vadd.f32 %v2796_v42, %v683_v45  ;;  %v2219_v47 = vpop.f32.mrb[2].mxu0  ;;  %v2250_v13 = vpop.f32.mrb[0].mxu1 }
  0xf1   : > { %v695_v48 = vadd.f32 %v2219_v47, %v2796_v42  ;;  %v686_v49 = vpop.f32.mrb[3].mxu0  ;;  %v940_v53 = vmax.f32 %v692_v44, 0.0  ;;  %v820_v16 = vadd.f32 %v2250_v13, %v2796_v42  ;;  %v811_v17 = vpop.f32.mrb[1].mxu1 }
  0xf2   : > { %v687_v52 = vadd.f32 %v2796_v42, %v686_v49  ;;  %v938_v55 = vmax.f32 %v684_v46, 0.0  ;;  %v812_v20 = vadd.f32 %v2796_v42, %v811_v17  ;;  %v2251_v21 = vpop.f32.mrb[2].mxu1 }
  0xf3   : > { %v941_v54 = vmax.f32 %v695_v48, 0.0  ;;  %v972_v24 = vmax.f32 %v820_v16, 0.0  ;;  %v823_v25 = vadd.f32 %v2251_v21, %v2796_v42  ;;  %v814_v26 = vpop.f32.mrb[3].mxu1 }
  0xf4   : > { %v939_v56 = vmax.f32 %v687_v52, 0.0  ;;  %v970_v29 = vmax.f32 %v812_v20, 0.0  ;;  %v815_v30 = vadd.f32 %v2796_v42, %v814_v26 }
  0xf5   : > { %v1003_v57 = vpack.c.bf16 %v941_v54, %v940_v53  ;;  %v973_v33 = vmax.f32 %v823_v25, 0.0 }
  0xf6   : > { %v1002_v59 = vpack.c.bf16 %v939_v56, %v938_v55  ;;  %v2222_v60 = vpop.f32.mrb[4].mxu0  ;;  %v971_v36 = vmax.f32 %v815_v30, 0.0 }
  0xf7   : > { %v708_v61 = vadd.f32 %v2222_v60, %v2796_v42  ;;  %v699_v62 = vpop.f32.mrb[5].mxu0  ;;  %v2832_v38 = vpack.c.bf16 %v973_v33, %v972_v24 }
  0xf8   : > { %v700_v63 = vadd.f32 %v2796_v42, %v699_v62  ;;  %v2223_v0 = vpop.f32.mrb[6].mxu0  ;;  %2296 = vmatprep.mubr.bf16.mxu1 %v1002_v59  ;;  %v2837_v43 = vpack.c.bf16 %v971_v36, %v970_v29  ;;  %v2254_v44 = vpop.f32.mrb[4].mxu1 }
  0xf9   : > { %v711_v1 = vadd.f32 %v2223_v0, %v2796_v42  ;;  %v702_v2 = vpop.f32.mrb[7].mxu0  ;;  %2297 = vmatmul.mubr.bf16.vlgmr.msra.gmra.mrb[32].mxu1 %v1003_v57  ;;  %v944_v5 = vmax.f32 %v708_v61, 0.0  ;;  %v836_v47 = vadd.f32 %v2254_v44, %v2796_v42  ;;  %v827_v48 = vpop.f32.mrb[5].mxu1 }
  0xfa   : > { %v703_v4 = vadd.f32 %v2796_v42, %v702_v2  ;;  %v942_v7 = vmax.f32 %v700_v63, 0.0  ;;  %v828_v51 = vadd.f32 %v2796_v42, %v827_v48  ;;  %v2255_v52 = vpop.f32.mrb[6].mxu1 }
  0xfb   : > { %v945_v6 = vmax.f32 %v711_v1, 0.0  ;;  %v976_v55 = vmax.f32 %v836_v47, 0.0  ;;  %v839_v56 = vadd.f32 %v2255_v52, %v2796_v42  ;;  %v830_v57 = vpop.f32.mrb[7].mxu1 }
  0xfc   : > { %v943_v8 = vmax.f32 %v703_v4, 0.0  ;;  %v974_v59 = vmax.f32 %v828_v51, 0.0  ;;  %v831_v60 = vadd.f32 %v2796_v42, %v830_v57 }
  0xfd   : > { %v1005_v9 = vpack.c.bf16 %v945_v6, %v944_v5  ;;  %v977_v63 = vmax.f32 %v839_v56, 0.0 }
  0xfe   : > { %v1004_v11 = vpack.c.bf16 %v943_v8, %v942_v7  ;;  %v2226_v12 = vpop.f32.mrb[8].mxu0  ;;  %v975_v2 = vmax.f32 %v831_v60, 0.0 }
  0xff   : > { %v724_v14 = vadd.f32 %v2226_v12, %v2796_v42  ;;  %v715_v15 = vpop.f32.mrb[9].mxu0  ;;  %v2847_v4 = vpack.c.bf16 %v977_v63, %v976_v55 }
 0x100   : > { %v716_v18 = vadd.f32 %v2796_v42, %v715_v15  ;;  %v2227_v19 = vpop.f32.mrb[10].mxu0  ;;  %2300 = vmatprep.mubr.bf16.mxu1 %v1004_v11  ;;  %v2849_v7 = vpack.c.bf16 %v975_v2, %v974_v59  ;;  %v2258_v8 = vpop.f32.mrb[8].mxu1 }
 0x101   : > { %v727_v22 = vadd.f32 %v2227_v19, %v2796_v42  ;;  %v718_v23 = vpop.f32.mrb[11].mxu0  ;;  %2301 = vmatmul.mubr.bf16.gmra.mrb[36].mxu1 %v1005_v9  ;;  %v948_v31 = vmax.f32 %v724_v14, 0.0  ;;  %v852_v11 = vadd.f32 %v2258_v8, %v2796_v42  ;;  %v843_v12 = vpop.f32.mrb[9].mxu1 }
 0x102   : > { %v719_v28 = vadd.f32 %v2796_v42, %v718_v23  ;;  %v946_v34 = vmax.f32 %v716_v18, 0.0  ;;  %v844_v15 = vadd.f32 %v2796_v42, %v843_v12  ;;  %v2259_v16 = vpop.f32.mrb[10].mxu1 }
 0x103   : > { %v949_v32 = vmax.f32 %v727_v22, 0.0  ;;  %v980_v19 = vmax.f32 %v852_v11, 0.0  ;;  %v855_v20 = vadd.f32 %v2259_v16, %v2796_v42  ;;  %v846_v21 = vpop.f32.mrb[11].mxu1 }
 0x104   : > { %v947_v35 = vmax.f32 %v719_v28, 0.0  ;;  %v978_v23 = vmax.f32 %v844_v15, 0.0  ;;  %v847_v24 = vadd.f32 %v2796_v42, %v846_v21 }
 0x105   : > { %v1007_v37 = vpack.c.bf16 %v949_v32, %v948_v31  ;;  %v981_v27 = vmax.f32 %v855_v20, 0.0 }
 0x106   : > { %v1006_v40 = vpack.c.bf16 %v947_v35, %v946_v34  ;;  %v2230_v41 = vpop.f32.mrb[12].mxu0  ;;  %v979_v30 = vmax.f32 %v847_v24, 0.0 }
 0x107   : > { %v740_v45 = vadd.f32 %v2230_v41, %v2796_v42  ;;  %v731_v46 = vpop.f32.mrb[13].mxu0  ;;  %v2859_v32 = vpack.c.bf16 %v981_v27, %v980_v19 }
 0x108   : > { %v732_v49 = vadd.f32 %v2796_v42, %v731_v46  ;;  %v2231_v50 = vpop.f32.mrb[14].mxu0  ;;  %2304 = vmatprep.mubr.bf16.mxu1 %v1006_v40  ;;  %v2861_v35 = vpack.c.bf16 %v979_v30, %v978_v23  ;;  %v2262_v36 = vpop.f32.mrb[12].mxu1 }
 0x109   : > { %v743_v53 = vadd.f32 %v2231_v50, %v2796_v42  ;;  %v734_v54 = vpop.f32.mrb[15].mxu0  ;;  %2305 = vmatmul.mubr.bf16.gmra.mrb[40].mxu1 %v1007_v37  ;;  %v952_v61 = vmax.f32 %v740_v45, 0.0  ;;  %v868_v40 = vadd.f32 %v2262_v36, %v2796_v42  ;;  %v859_v41 = vpop.f32.mrb[13].mxu1 }
 0x10a   : > { %v735_v58 = vadd.f32 %v2796_v42, %v734_v54  ;;  %v950_v0 = vmax.f32 %v732_v49, 0.0  ;;  %v860_v46 = vadd.f32 %v2796_v42, %v859_v41  ;;  %v2263_v47 = vpop.f32.mrb[14].mxu1 }
 0x10b   : > { %v953_v62 = vmax.f32 %v743_v53, 0.0  ;;  %v984_v50 = vmax.f32 %v868_v40, 0.0  ;;  %v871_v51 = vadd.f32 %v2263_v47, %v2796_v42  ;;  %v862_v52 = vpop.f32.mrb[15].mxu1 }
 0x10c   : > { %v951_v1 = vmax.f32 %v735_v58, 0.0  ;;  %v982_v54 = vmax.f32 %v860_v46, 0.0  ;;  %v863_v55 = vadd.f32 %v2796_v42, %v862_v52 }
 0x10d   : > { %v1009_v3 = vpack.c.bf16 %v953_v62, %v952_v61  ;;  %v985_v58 = vmax.f32 %v871_v51, 0.0 }
 0x10e   : > { %v1008_v5 = vpack.c.bf16 %v951_v1, %v950_v0  ;;  %v2234_v6 = vpop.f32.mrb[16].mxu0  ;;  %v983_v61 = vmax.f32 %v863_v55, 0.0 }
 0x10f   : > { %v756_v9 = vadd.f32 %v2234_v6, %v2796_v42  ;;  %v747_v10 = vpop.f32.mrb[17].mxu0  ;;  %v2871_v63 = vpack.c.bf16 %v985_v58, %v984_v50 }
 0x110   : > { %v748_v13 = vadd.f32 %v2796_v42, %v747_v10  ;;  %v2235_v14 = vpop.f32.mrb[18].mxu0  ;;  %2308 = vmatprep.mubr.bf16.mxu1 %v1008_v5  ;;  %v2873_v2 = vpack.c.bf16 %v983_v61, %v982_v54 }
 0x111   : > { %v759_v17 = vadd.f32 %v2235_v14, %v2796_v42  ;;  %v750_v18 = vpop.f32.mrb[19].mxu0  ;;  %2309 = vmatmul.mubr.bf16.gmra.mrb[44].mxu1 %v1009_v3  ;;  %v956_v25 = vmax.f32 %v756_v9, 0.0  ;;  %v2266_v3 = vpop.f32.mrb[16].mxu1 }
 0x112   : > { %v751_v22 = vadd.f32 %v2796_v42, %v750_v18  ;;  %v954_v28 = vmax.f32 %v748_v13, 0.0  ;;  %v884_v8 = vadd.f32 %v2266_v3, %v2796_v42  ;;  %v875_v9 = vpop.f32.mrb[17].mxu1 }
 0x113   : > { %v957_v26 = vmax.f32 %v759_v17, 0.0  ;;  %v876_v12 = vadd.f32 %v2796_v42, %v875_v9  ;;  %v2267_v13 = vpop.f32.mrb[18].mxu1 }
 0x114   : > { %v955_v29 = vmax.f32 %v751_v22, 0.0  ;;  %v988_v16 = vmax.f32 %v884_v8, 0.0  ;;  %v887_v17 = vadd.f32 %v2267_v13, %v2796_v42  ;;  %v878_v18 = vpop.f32.mrb[19].mxu1 }
 0x115   : > { %v1011_v31 = vpack.c.bf16 %v957_v26, %v956_v25  ;;  %v986_v20 = vmax.f32 %v876_v12, 0.0  ;;  %v879_v21 = vadd.f32 %v2796_v42, %v878_v18 }
 0x116   : > { %v1010_v33 = vpack.c.bf16 %v955_v29, %v954_v28  ;;  %v2238_v34 = vpop.f32.mrb[20].mxu0  ;;  %v989_v24 = vmax.f32 %v887_v17, 0.0 }
 0x117   : > { %v772_v37 = vadd.f32 %v2238_v34, %v2796_v42  ;;  %v763_v39 = vpop.f32.mrb[21].mxu0  ;;  %v987_v27 = vmax.f32 %v879_v21, 0.0 }
 0x118   : > { %v764_v44 = vadd.f32 %v2796_v42, %v763_v39  ;;  %v2239_v45 = vpop.f32.mrb[22].mxu0  ;;  %2312 = vmatprep.mubr.bf16.mxu1 %v1010_v33  ;;  %v2883_v29 = vpack.c.bf16 %v989_v24, %v988_v16  ;;  %v2270_v34 = vpop.f32.mrb[20].mxu1 }
 0x119   : > { %v775_v48 = vadd.f32 %v2239_v45, %v2796_v42  ;;  %v766_v49 = vpop.f32.mrb[23].mxu0  ;;  %2313 = vmatmul.mubr.bf16.gmra.mrb[48].mxu1 %v1011_v31  ;;  %v960_v56 = vmax.f32 %v772_v37, 0.0  ;;  %v2885_v33 = vpack.c.bf16 %v987_v27, %v986_v20  ;;  %v900_v39 = vadd.f32 %v2270_v34, %v2796_v42  ;;  %v891_v40 = vpop.f32.mrb[21].mxu1 }
 0x11a   : > { %v767_v53 = vadd.f32 %v2796_v42, %v766_v49  ;;  %v958_v59 = vmax.f32 %v764_v44, 0.0  ;;  %v892_v45 = vadd.f32 %v2796_v42, %v891_v40  ;;  %v2271_v46 = vpop.f32.mrb[22].mxu1 }
 0x11b   : > { %v961_v57 = vmax.f32 %v775_v48, 0.0  ;;  %v992_v49 = vmax.f32 %v900_v39, 0.0  ;;  %v903_v50 = vadd.f32 %v2271_v46, %v2796_v42  ;;  %v894_v51 = vpop.f32.mrb[23].mxu1 }
 0x11c   : > { %v959_v60 = vmax.f32 %v767_v53, 0.0  ;;  %v990_v53 = vmax.f32 %v892_v45, 0.0  ;;  %v895_v54 = vadd.f32 %v2796_v42, %v894_v51 }
 0x11d   : > { %v1013_v62 = vpack.c.bf16 %v961_v57, %v960_v56  ;;  %v993_v57 = vmax.f32 %v903_v50, 0.0 }
 0x11e   : > { %v1012_v0 = vpack.c.bf16 %v959_v60, %v958_v59  ;;  %v2242_v1 = vpop.f32.mrb[24].mxu0  ;;  %v991_v60 = vmax.f32 %v895_v54, 0.0 }
 0x11f   : > { %v788_v5 = vadd.f32 %v2242_v1, %v2796_v42  ;;  %v779_v6 = vpop.f32.mrb[25].mxu0 }
 0x120   : > { %v780_v10 = vadd.f32 %v2796_v42, %v779_v6  ;;  %v2243_v11 = vpop.f32.mrb[26].mxu0  ;;  %2316 = vmatprep.mubr.bf16.mxu1 %v1012_v0  ;;  %v1028_v1 = vpack.c.bf16 %v991_v60, %v990_v53  ;;  %v2274_v3 = vpop.f32.mrb[24].mxu1 }
 0x121   : > { %v791_v14 = vadd.f32 %v2243_v11, %v2796_v42  ;;  %v782_v15 = vpop.f32.mrb[27].mxu0  ;;  %2317 = vmatmul.mubr.bf16.gmra.mrb[52].mxu1 %v1013_v62  ;;  %v964_v22 = vmax.f32 %v788_v5, 0.0  ;;  %v1029_v62 = vpack.c.bf16 %v993_v57, %v992_v49  ;;  %v916_v5 = vadd.f32 %v2274_v3, %v2796_v42  ;;  %v907_v6 = vpop.f32.mrb[25].mxu1 }
 0x122   : > { %v783_v19 = vadd.f32 %v2796_v42, %v782_v15  ;;  %v962_v25 = vmax.f32 %v780_v10, 0.0  ;;  %v908_v8 = vadd.f32 %v2796_v42, %v907_v6  ;;  %v2275_v9 = vpop.f32.mrb[26].mxu1 }
 0x123   : > { %v965_v23 = vmax.f32 %v791_v14, 0.0  ;;  %v996_v10 = vmax.f32 %v916_v5, 0.0  ;;  %v919_v11 = vadd.f32 %v2275_v9, %v2796_v42  ;;  %v910_v12 = vpop.f32.mrb[27].mxu1 }
 0x124   : > { %v963_v26 = vmax.f32 %v783_v19, 0.0  ;;  %v994_v13 = vmax.f32 %v908_v8, 0.0  ;;  %v911_v14 = vadd.f32 %v2796_v42, %v910_v12 }
 0x125   : > { %v1015_v28 = vpack.c.bf16 %v965_v23, %v964_v22  ;;  %v997_v15 = vmax.f32 %v919_v11, 0.0 }
 0x126   : > { %v1014_v30 = vpack.c.bf16 %v963_v26, %v962_v25  ;;  %v2246_v31 = vpop.f32.mrb[28].mxu0  ;;  %v995_v16 = vmax.f32 %v911_v14, 0.0 }
 0x127   : > { %v804_v36 = vadd.f32 %v2246_v31, %v2796_v42  ;;  %v795_v37 = vpop.f32.mrb[29].mxu0  ;;  %v1031_v17 = vpack.c.bf16 %v997_v15, %v996_v10 }
 0x128   : > { %v796_v41 = vadd.f32 %v2796_v42, %v795_v37  ;;  %v2247_v44 = vpop.f32.mrb[30].mxu0  ;;  %2320 = vmatprep.mubr.bf16.mxu1 %v1014_v30  ;;  %v1030_v18 = vpack.c.bf16 %v995_v16, %v994_v13  ;;  %v2278_v19 = vpop.f32.mrb[28].mxu1 }
 0x129   : > { %v807_v47 = vadd.f32 %v2247_v44, %v2796_v42  ;;  %v798_v48 = vpop.f32.mrb[31].mxu0  ;;  %2321 = vmatmul.mubr.bf16.gmra.mrb[56].mxu1 %v1015_v28  ;;  %v968_v55 = vmax.f32 %v804_v36, 0.0  ;;  %v932_v20 = vadd.f32 %v2278_v19, %v2796_v42  ;;  %v923_v21 = vpop.f32.mrb[29].mxu1 }
 0x12a   : > { %v799_v52 = vadd.f32 %v2796_v42, %v798_v48  ;;  %v966_v58 = vmax.f32 %v796_v41, 0.0  ;;  %v924_v22 = vadd.f32 %v2796_v42, %v923_v21  ;;  %v2279_v23 = vpop.f32.mrb[30].mxu1 }
 0x12b   : > { %v969_v56 = vmax.f32 %v807_v47, 0.0  ;;  %v1000_v24 = vmax.f32 %v932_v20, 0.0  ;;  %v935_v25 = vadd.f32 %v2279_v23, %v2796_v42 }
 0x12c   : > { %v967_v59 = vmax.f32 %v799_v52, 0.0  ;;  %v998_v26 = vmax.f32 %v924_v22, 0.0 }
 0x12d   : > { %v1017_v61 = vpack.c.bf16 %v969_v56, %v968_v55  ;;  %v1001_v28 = vmax.f32 %v935_v25, 0.0 }
 0x12e   : > { %v1016_v0 = vpack.c.bf16 %v967_v59, %v966_v58 }
 0x12f   : > { %v1033_v31 = vpack.c.bf16 %v1001_v28, %v1000_v24 }
 0x130   : > { %2324 = vmatprep.mubr.bf16.mxu1 %v1016_v0 }
 0x131   : > { %2325 = vmatmul.mubr.bf16.gmra.mrb[60].mxu1 %v1017_v61 }
 0x132   : > { %2328 = vmatprep.mubr.bf16.mxu1 %v2837_v43  ;;  %v926_v43 = vpop.f32.mrb[31].mxu1 }
 0x133   : > { %v927_v27 = vadd.f32 %v2796_v42, %v926_v43  ;;  %v2919_v42 = vld [vmem:[%s3190_s4] ss:$0 sm:$0xff] }
 0x135   : > { %v999_v30 = vmax.f32 %v927_v27, 0.0 }
 0x137   : > { %v1032_v34 = vpack.c.bf16 %v999_v30, %v998_v26 }
 0x139   : > { %2329 = vmatmul.mubr.bf16.gmra.mrb[64].mxu1 %v2832_v38  ;;  %v2533_v38 = vld [vmem:[%s3191_s5 + $0x38] sm:$0xff]  }
 0x13a   : > { %2332 = vmatprep.mubr.bf16.mxu1 %v2849_v7  ;;  %2374 = vmatprep.subr.bf16.mxu0 %v2533_v38 }
 0x13b   : > { %2375 = vmatpush3.bf16.msra.mxu0 %v2533_v38 }
 0x141   : > { %2333 = vmatmul.mubr.bf16.gmra.mrb[68].mxu1 %v2847_v4 }
 0x142   : > { %2336 = vmatprep.mubr.bf16.mxu1 %v2861_v35 }
 0x149   : > { %2337 = vmatmul.mubr.bf16.gmra.mrb[72].mxu1 %v2859_v32 }
 0x14a   : > { %2340 = vmatprep.mubr.bf16.mxu1 %v2873_v2 }
 0x151   : > { %2341 = vmatmul.mubr.bf16.gmra.mrb[76].mxu1 %v2871_v63 }
 0x152   : > { %2344 = vmatprep.mubr.bf16.mxu1 %v2885_v33 }
 0x159   : > { %2345 = vmatmul.mubr.bf16.gmra.mrb[80].mxu1 %v2883_v29 }
 0x15a   : > { %2348 = vmatprep.mubr.bf16.mxu1 %v1028_v1 }
 0x161   : > { %2349 = vmatmul.mubr.bf16.gmra.mrb[84].mxu1 %v1029_v62 }
 0x162   : > { %2352 = vmatprep.mubr.bf16.mxu1 %v1030_v18 }
 0x169   : > { %2353 = vmatmul.mubr.bf16.gmra.mrb[88].mxu1 %v1031_v17 }
 0x16a   : > { %2356 = vmatprep.mubr.bf16.mxu1 %v1032_v34 }
 0x171   : > { %2357 = vmatmul.mubr.bf16.gmra.mrb[92].mxu1 %v1033_v31 }
 0x1cc   : > { %v2298_v4 = vpop.f32.mrb[32].mxu1 }
 0x1cd   : > { %v1148_v7 = vadd.f32 %v2298_v4, %v2919_v42  ;;  %v1139_v32 = vpop.f32.mrb[33].mxu1 }
 0x1ce   : > { %v1140_v35 = vadd.f32 %v2919_v42, %v1139_v32  ;;  %v2299_v63 = vpop.f32.mrb[34].mxu1 }
 0x1cf   : > { %v1151_v2 = vadd.f32 %v2299_v63, %v2919_v42  ;;  %v1142_v29 = vpop.f32.mrb[35].mxu1  ;;  %v1396_v36 = vmax.f32 %v1148_v7, 0.0 }
 0x1d0   : > { %v1143_v33 = vadd.f32 %v2919_v42, %v1142_v29  ;;  %v1394_v39 = vmax.f32 %v1140_v35, 0.0 }
 0x1d1   : > { %v1397_v37 = vmax.f32 %v1151_v2, 0.0 }
 0x1d2   : > { %v1395_v40 = vmax.f32 %v1143_v33, 0.0 }
 0x1d3   : > { %v1459_v41 = vpack.c.bf16 %v1397_v37, %v1396_v36 }
 0x1d4   : > { %v1458_v44 = vpack.c.bf16 %v1395_v40, %v1394_v39  ;;  %v2302_v45 = vpop.f32.mrb[36].mxu1 }
 0x1d5   : > { %v1164_v46 = vadd.f32 %v2302_v45, %v2919_v42  ;;  %v1155_v47 = vpop.f32.mrb[37].mxu1 }
 0x1d6   : > { %v1156_v48 = vadd.f32 %v2919_v42, %v1155_v47  ;;  %v2303_v49 = vpop.f32.mrb[38].mxu1  ;;  %2376 = vmatprep.mubr.bf16.mxu0 %v1458_v44 }
 0x1d7   : > { %v1167_v50 = vadd.f32 %v2303_v49, %v2919_v42  ;;  %v1158_v51 = vpop.f32.mrb[39].mxu1  ;;  %2377 = vmatmul.mubr.bf16.vlgmr.msra.gmra.mrb[32].mxu0 %v1459_v41  ;;  %v1400_v53 = vmax.f32 %v1164_v46, 0.0 }
 0x1d8   : > { %v1159_v52 = vadd.f32 %v2919_v42, %v1158_v51  ;;  %v1398_v55 = vmax.f32 %v1156_v48, 0.0 }
 0x1d9   : > { %v1401_v54 = vmax.f32 %v1167_v50, 0.0 }
 0x1da   : > { %v1399_v56 = vmax.f32 %v1159_v52, 0.0 }
 0x1db   : > { %v1461_v57 = vpack.c.bf16 %v1401_v54, %v1400_v53 }
 0x1dc   : > { %v1460_v58 = vpack.c.bf16 %v1399_v56, %v1398_v55  ;;  %v2306_v59 = vpop.f32.mrb[40].mxu1 }
 0x1dd   : > { %v1180_v60 = vadd.f32 %v2306_v59, %v2919_v42  ;;  %v1171_v61 = vpop.f32.mrb[41].mxu1 }
 0x1de   : > { %v1172_v62 = vadd.f32 %v2919_v42, %v1171_v61  ;;  %v2307_v0 = vpop.f32.mrb[42].mxu1  ;;  %2380 = vmatprep.mubr.bf16.mxu0 %v1460_v58 }
 0x1df   : > { %v1183_v1 = vadd.f32 %v2307_v0, %v2919_v42  ;;  %v1174_v3 = vpop.f32.mrb[43].mxu1  ;;  %2381 = vmatmul.mubr.bf16.gmra.mrb[36].mxu0 %v1461_v57  ;;  %v1404_v6 = vmax.f32 %v1180_v60, 0.0 }
 0x1e0   : > { %v1175_v5 = vadd.f32 %v2919_v42, %v1174_v3  ;;  %v1402_v9 = vmax.f32 %v1172_v62, 0.0 }
 0x1e1   : > { %v1405_v8 = vmax.f32 %v1183_v1, 0.0 }
 0x1e2   : > { %v1403_v10 = vmax.f32 %v1175_v5, 0.0 }
 0x1e3   : > { %v1463_v11 = vpack.c.bf16 %v1405_v8, %v1404_v6 }
 0x1e4   : > { %v1462_v12 = vpack.c.bf16 %v1403_v10, %v1402_v9  ;;  %v2310_v13 = vpop.f32.mrb[44].mxu1 }
 0x1e5   : > { %v1196_v14 = vadd.f32 %v2310_v13, %v2919_v42  ;;  %v1187_v15 = vpop.f32.mrb[45].mxu1 }
 0x1e6   : > { %v1188_v16 = vadd.f32 %v2919_v42, %v1187_v15  ;;  %v2311_v17 = vpop.f32.mrb[46].mxu1  ;;  %2384 = vmatprep.mubr.bf16.mxu0 %v1462_v12 }
 0x1e7   : > { %v1199_v18 = vadd.f32 %v2311_v17, %v2919_v42  ;;  %v1190_v19 = vpop.f32.mrb[47].mxu1  ;;  %2385 = vmatmul.mubr.bf16.gmra.mrb[40].mxu0 %v1463_v11  ;;  %v1408_v21 = vmax.f32 %v1196_v14, 0.0 }
 0x1e8   : > { %v1191_v20 = vadd.f32 %v2919_v42, %v1190_v19  ;;  %v1406_v23 = vmax.f32 %v1188_v16, 0.0 }
 0x1e9   : > { %v1409_v22 = vmax.f32 %v1199_v18, 0.0 }
 0x1ea   : > { %v1407_v24 = vmax.f32 %v1191_v20, 0.0 }
 0x1eb   : > { %v1465_v25 = vpack.c.bf16 %v1409_v22, %v1408_v21 }
 0x1ec   : > { %v1464_v43 = vpack.c.bf16 %v1407_v24, %v1406_v23  ;;  %v2314_v26 = vpop.f32.mrb[48].mxu1 }
 0x1ed   : > { %v1212_v27 = vadd.f32 %v2314_v26, %v2919_v42  ;;  %v1203_v28 = vpop.f32.mrb[49].mxu1 }
 0x1ee   : > { %v1204_v30 = vadd.f32 %v2919_v42, %v1203_v28  ;;  %v2315_v31 = vpop.f32.mrb[50].mxu1  ;;  %2388 = vmatprep.mubr.bf16.mxu0 %v1464_v43 }
 0x1ef   : > { %v1215_v34 = vadd.f32 %v2315_v31, %v2919_v42  ;;  %v1206_v38 = vpop.f32.mrb[51].mxu1  ;;  %2389 = vmatmul.mubr.bf16.gmra.mrb[44].mxu0 %v1465_v25  ;;  %v1412_v7 = vmax.f32 %v1212_v27, 0.0 }
 0x1f0   : > { %v1207_v4 = vadd.f32 %v2919_v42, %v1206_v38  ;;  %v1410_v35 = vmax.f32 %v1204_v30, 0.0 }
 0x1f1   : > { %v1413_v32 = vmax.f32 %v1215_v34, 0.0 }
 0x1f2   : > { %v1411_v63 = vmax.f32 %v1207_v4, 0.0 }
 0x1f3   : > { %v1467_v2 = vpack.c.bf16 %v1413_v32, %v1412_v7 }
 0x1f4   : > { %v1466_v29 = vpack.c.bf16 %v1411_v63, %v1410_v35  ;;  %v2318_v33 = vpop.f32.mrb[52].mxu1 }
 0x1f5   : > { %v1228_v36 = vadd.f32 %v2318_v33, %v2919_v42  ;;  %v1219_v37 = vpop.f32.mrb[53].mxu1 }
 0x1f6   : > { %v1220_v39 = vadd.f32 %v2919_v42, %v1219_v37  ;;  %v2319_v40 = vpop.f32.mrb[54].mxu1  ;;  %2392 = vmatprep.mubr.bf16.mxu0 %v1466_v29 }
 0x1f7   : > { %v1231_v41 = vadd.f32 %v2319_v40, %v2919_v42  ;;  %v1222_v44 = vpop.f32.mrb[55].mxu1  ;;  %2393 = vmatmul.mubr.bf16.gmra.mrb[48].mxu0 %v1467_v2  ;;  %v1416_v46 = vmax.f32 %v1228_v36, 0.0 }
 0x1f8   : > { %v1223_v45 = vadd.f32 %v2919_v42, %v1222_v44  ;;  %v1414_v48 = vmax.f32 %v1220_v39, 0.0 }
 0x1f9   : > { %v1417_v47 = vmax.f32 %v1231_v41, 0.0 }
 0x1fa   : > { %v1415_v49 = vmax.f32 %v1223_v45, 0.0 }
 0x1fb   : > { %v1469_v50 = vpack.c.bf16 %v1417_v47, %v1416_v46 }
 0x1fc   : > { %v1468_v51 = vpack.c.bf16 %v1415_v49, %v1414_v48  ;;  %v2322_v52 = vpop.f32.mrb[56].mxu1 }
 0x1fd   : > { %v1244_v53 = vadd.f32 %v2322_v52, %v2919_v42  ;;  %v1235_v54 = vpop.f32.mrb[57].mxu1 }
 0x1fe   : > { %v1236_v55 = vadd.f32 %v2919_v42, %v1235_v54  ;;  %v2323_v56 = vpop.f32.mrb[58].mxu1  ;;  %2396 = vmatprep.mubr.bf16.mxu0 %v1468_v51 }
 0x1ff   : > { %v1247_v57 = vadd.f32 %v2323_v56, %v2919_v42  ;;  %v1238_v58 = vpop.f32.mrb[59].mxu1  ;;  %2397 = vmatmul.mubr.bf16.gmra.mrb[52].mxu0 %v1469_v50  ;;  %v1420_v60 = vmax.f32 %v1244_v53, 0.0 }
 0x200   : > { %v1239_v59 = vadd.f32 %v2919_v42, %v1238_v58  ;;  %v1418_v62 = vmax.f32 %v1236_v55, 0.0 }
 0x201   : > { %v1421_v61 = vmax.f32 %v1247_v57, 0.0 }
 0x202   : > { %v1419_v0 = vmax.f32 %v1239_v59, 0.0 }
 0x203   : > { %v1471_v1 = vpack.c.bf16 %v1421_v61, %v1420_v60 }
 0x204   : > { %v1470_v3 = vpack.c.bf16 %v1419_v0, %v1418_v62  ;;  %v2326_v5 = vpop.f32.mrb[60].mxu1 }
 0x205   : > { %v1260_v6 = vadd.f32 %v2326_v5, %v2919_v42  ;;  %v1251_v8 = vpop.f32.mrb[61].mxu1 }
 0x206   : > { %v1252_v9 = vadd.f32 %v2919_v42, %v1251_v8  ;;  %v2327_v10 = vpop.f32.mrb[62].mxu1  ;;  %2400 = vmatprep.mubr.bf16.mxu0 %v1470_v3 }
 0x207   : > { %v1263_v11 = vadd.f32 %v2327_v10, %v2919_v42  ;;  %v1254_v12 = vpop.f32.mrb[63].mxu1  ;;  %2401 = vmatmul.mubr.bf16.gmra.mrb[56].mxu0 %v1471_v1  ;;  %v1424_v14 = vmax.f32 %v1260_v6, 0.0 }
 0x208   : > { %v1255_v13 = vadd.f32 %v2919_v42, %v1254_v12  ;;  %v1422_v16 = vmax.f32 %v1252_v9, 0.0 }
 0x209   : > { %v1425_v15 = vmax.f32 %v1263_v11, 0.0 }
 0x20a   : > { %v1423_v17 = vmax.f32 %v1255_v13, 0.0 }
 0x20b   : > { %v1473_v18 = vpack.c.bf16 %v1425_v15, %v1424_v14 }
 0x20c   : > { %v1472_v19 = vpack.c.bf16 %v1423_v17, %v1422_v16  ;;  %v2330_v20 = vpop.f32.mrb[64].mxu1 }
 0x20d   : > { %v1276_v21 = vadd.f32 %v2330_v20, %v2919_v42  ;;  %v1267_v22 = vpop.f32.mrb[65].mxu1 }
 0x20e   : > { %v1268_v23 = vadd.f32 %v2919_v42, %v1267_v22  ;;  %v2331_v24 = vpop.f32.mrb[66].mxu1  ;;  %2404 = vmatprep.mubr.bf16.mxu0 %v1472_v19 }
 0x20f   : > { %v1279_v25 = vadd.f32 %v2331_v24, %v2919_v42  ;;  %v1270_v43 = vpop.f32.mrb[67].mxu1  ;;  %2405 = vmatmul.mubr.bf16.gmra.mrb[60].mxu0 %v1473_v18  ;;  %v1428_v27 = vmax.f32 %v1276_v21, 0.0 }
 0x210   : > { %v1271_v26 = vadd.f32 %v2919_v42, %v1270_v43  ;;  %v1426_v30 = vmax.f32 %v1268_v23, 0.0 }
 0x211   : > { %v1429_v28 = vmax.f32 %v1279_v25, 0.0 }
 0x212   : > { %v1427_v31 = vmax.f32 %v1271_v26, 0.0 }
 0x213   : > { %v1475_v34 = vpack.c.bf16 %v1429_v28, %v1428_v27 }
 0x214   : > { %v1474_v38 = vpack.c.bf16 %v1427_v31, %v1426_v30  ;;  %v2334_v4 = vpop.f32.mrb[68].mxu1 }
 0x215   : > { %v1292_v7 = vadd.f32 %v2334_v4, %v2919_v42  ;;  %v1283_v32 = vpop.f32.mrb[69].mxu1 }
 0x216   : > { %v1284_v35 = vadd.f32 %v2919_v42, %v1283_v32  ;;  %v2335_v63 = vpop.f32.mrb[70].mxu1  ;;  %2408 = vmatprep.mubr.bf16.mxu0 %v1474_v38 }
 0x217   : > { %v1295_v2 = vadd.f32 %v2335_v63, %v2919_v42  ;;  %v1286_v29 = vpop.f32.mrb[71].mxu1  ;;  %2409 = vmatmul.mubr.bf16.gmra.mrb[64].mxu0 %v1475_v34  ;;  %v1432_v36 = vmax.f32 %v1292_v7, 0.0 }
 0x218   : > { %v1287_v33 = vadd.f32 %v2919_v42, %v1286_v29  ;;  %v1430_v39 = vmax.f32 %v1284_v35, 0.0 }
 0x219   : > { %v1433_v37 = vmax.f32 %v1295_v2, 0.0 }
 0x21a   : > { %v1431_v40 = vmax.f32 %v1287_v33, 0.0 }
 0x21b   : > { %v1477_v41 = vpack.c.bf16 %v1433_v37, %v1432_v36 }
 0x21c   : > { %v1476_v44 = vpack.c.bf16 %v1431_v40, %v1430_v39  ;;  %v2338_v45 = vpop.f32.mrb[72].mxu1 }
 0x21d   : > { %v1308_v46 = vadd.f32 %v2338_v45, %v2919_v42  ;;  %v1299_v47 = vpop.f32.mrb[73].mxu1 }
 0x21e   : > { %v1300_v48 = vadd.f32 %v2919_v42, %v1299_v47  ;;  %v2339_v49 = vpop.f32.mrb[74].mxu1  ;;  %2412 = vmatprep.mubr.bf16.mxu0 %v1476_v44 }
 0x21f   : > { %v1311_v50 = vadd.f32 %v2339_v49, %v2919_v42  ;;  %v1302_v51 = vpop.f32.mrb[75].mxu1  ;;  %2413 = vmatmul.mubr.bf16.gmra.mrb[68].mxu0 %v1477_v41  ;;  %v1436_v53 = vmax.f32 %v1308_v46, 0.0 }
 0x220   : > { %v1303_v52 = vadd.f32 %v2919_v42, %v1302_v51  ;;  %v1434_v55 = vmax.f32 %v1300_v48, 0.0 }
 0x221   : > { %v1437_v54 = vmax.f32 %v1311_v50, 0.0 }
 0x222   : > { %v1435_v56 = vmax.f32 %v1303_v52, 0.0 }
 0x223   : > { %v1479_v57 = vpack.c.bf16 %v1437_v54, %v1436_v53 }
 0x224   : > { %v1478_v58 = vpack.c.bf16 %v1435_v56, %v1434_v55  ;;  %v2342_v59 = vpop.f32.mrb[76].mxu1 }
 0x225   : > { %v1324_v60 = vadd.f32 %v2342_v59, %v2919_v42  ;;  %v1315_v61 = vpop.f32.mrb[77].mxu1 }
 0x226   : > { %v1316_v62 = vadd.f32 %v2919_v42, %v1315_v61  ;;  %v2343_v0 = vpop.f32.mrb[78].mxu1  ;;  %2416 = vmatprep.mubr.bf16.mxu0 %v1478_v58 }
 0x227   : > { %v1327_v1 = vadd.f32 %v2343_v0, %v2919_v42  ;;  %v1318_v3 = vpop.f32.mrb[79].mxu1  ;;  %2417 = vmatmul.mubr.bf16.gmra.mrb[72].mxu0 %v1479_v57  ;;  %v1440_v6 = vmax.f32 %v1324_v60, 0.0 }
 0x228   : > { %v1319_v5 = vadd.f32 %v2919_v42, %v1318_v3  ;;  %v1438_v9 = vmax.f32 %v1316_v62, 0.0 }
 0x229   : > { %v1441_v8 = vmax.f32 %v1327_v1, 0.0 }
 0x22a   : > { %v1439_v10 = vmax.f32 %v1319_v5, 0.0  ;;  %v2991_v5 = vld [vmem:[%s3192_s6] ss:$0 sm:$0xff] }
 0x22b   : > { %v1481_v11 = vpack.c.bf16 %v1441_v8, %v1440_v6 }
 0x22c   : > { %v1480_v12 = vpack.c.bf16 %v1439_v10, %v1438_v9  ;;  %v2346_v13 = vpop.f32.mrb[80].mxu1 }
 0x22d   : > { %v1340_v14 = vadd.f32 %v2346_v13, %v2919_v42  ;;  %v1331_v15 = vpop.f32.mrb[81].mxu1 }
 0x22e   : > { %v1332_v16 = vadd.f32 %v2919_v42, %v1331_v15  ;;  %v2347_v17 = vpop.f32.mrb[82].mxu1  ;;  %2420 = vmatprep.mubr.bf16.mxu0 %v1480_v12 }
 0x22f   : > { %v1343_v18 = vadd.f32 %v2347_v17, %v2919_v42  ;;  %v1334_v19 = vpop.f32.mrb[83].mxu1  ;;  %2421 = vmatmul.mubr.bf16.gmra.mrb[76].mxu0 %v1481_v11  ;;  %v1444_v21 = vmax.f32 %v1340_v14, 0.0 }
 0x230   : > { %v1335_v20 = vadd.f32 %v2919_v42, %v1334_v19  ;;  %v1442_v23 = vmax.f32 %v1332_v16, 0.0 }
 0x231   : > { %v1445_v22 = vmax.f32 %v1343_v18, 0.0 }
 0x232   : > { %v1443_v24 = vmax.f32 %v1335_v20, 0.0 }
 0x233   : > { %v1483_v25 = vpack.c.bf16 %v1445_v22, %v1444_v21 }
 0x234   : > { %v1482_v43 = vpack.c.bf16 %v1443_v24, %v1442_v23  ;;  %v2350_v26 = vpop.f32.mrb[84].mxu1 }
 0x235   : > { %v1356_v27 = vadd.f32 %v2350_v26, %v2919_v42  ;;  %v1347_v28 = vpop.f32.mrb[85].mxu1 }
 0x236   : > { %v1348_v30 = vadd.f32 %v2919_v42, %v1347_v28  ;;  %v2351_v31 = vpop.f32.mrb[86].mxu1  ;;  %2424 = vmatprep.mubr.bf16.mxu0 %v1482_v43 }
 0x237   : > { %v1359_v34 = vadd.f32 %v2351_v31, %v2919_v42  ;;  %v1350_v38 = vpop.f32.mrb[87].mxu1  ;;  %2425 = vmatmul.mubr.bf16.gmra.mrb[80].mxu0 %v1483_v25  ;;  %v1448_v7 = vmax.f32 %v1356_v27, 0.0 }
 0x238   : > { %v1351_v4 = vadd.f32 %v2919_v42, %v1350_v38  ;;  %v1446_v35 = vmax.f32 %v1348_v30, 0.0 }
 0x239   : > { %v1449_v32 = vmax.f32 %v1359_v34, 0.0 }
 0x23a   : > { %v1447_v63 = vmax.f32 %v1351_v4, 0.0 }
 0x23b   : > { %v1485_v2 = vpack.c.bf16 %v1449_v32, %v1448_v7 }
 0x23c   : > { %v1484_v29 = vpack.c.bf16 %v1447_v63, %v1446_v35  ;;  %v2354_v33 = vpop.f32.mrb[88].mxu1 }
 0x23d   : > { %v1372_v36 = vadd.f32 %v2354_v33, %v2919_v42  ;;  %v1363_v37 = vpop.f32.mrb[89].mxu1 }
 0x23e   : > { %v1364_v39 = vadd.f32 %v2919_v42, %v1363_v37  ;;  %v2355_v40 = vpop.f32.mrb[90].mxu1  ;;  %2428 = vmatprep.mubr.bf16.mxu0 %v1484_v29 }
 0x23f   : > { %v1375_v41 = vadd.f32 %v2355_v40, %v2919_v42  ;;  %v1366_v44 = vpop.f32.mrb[91].mxu1  ;;  %2429 = vmatmul.mubr.bf16.gmra.mrb[84].mxu0 %v1485_v2  ;;  %v1452_v46 = vmax.f32 %v1372_v36, 0.0 }
 0x240   : > { %v1367_v45 = vadd.f32 %v2919_v42, %v1366_v44  ;;  %v1450_v48 = vmax.f32 %v1364_v39, 0.0 }
 0x241   : > { %v1453_v47 = vmax.f32 %v1375_v41, 0.0 }
 0x242   : > { %v1451_v49 = vmax.f32 %v1367_v45, 0.0 }
 0x243   : > { %v1487_v50 = vpack.c.bf16 %v1453_v47, %v1452_v46 }
 0x244   : > { %v1486_v51 = vpack.c.bf16 %v1451_v49, %v1450_v48  ;;  %v2358_v52 = vpop.f32.mrb[92].mxu1 }
 0x245   : > { %v1388_v53 = vadd.f32 %v2358_v52, %v2919_v42  ;;  %v1379_v54 = vpop.f32.mrb[93].mxu1 }
 0x246   : > { %v1380_v55 = vadd.f32 %v2919_v42, %v1379_v54  ;;  %v2359_v56 = vpop.f32.mrb[94].mxu1  ;;  %2432 = vmatprep.mubr.bf16.mxu0 %v1486_v51 }
 0x247   : > { %v1391_v57 = vadd.f32 %v2359_v56, %v2919_v42  ;;  %v1382_v58 = vpop.f32.mrb[95].mxu1  ;;  %2433 = vmatmul.mubr.bf16.gmra.mrb[88].mxu0 %v1487_v50  ;;  %v1456_v60 = vmax.f32 %v1388_v53, 0.0 }
 0x248   : > { %v1383_v59 = vadd.f32 %v2919_v42, %v1382_v58  ;;  %v1454_v62 = vmax.f32 %v1380_v55, 0.0 }
 0x249   : > { %v1457_v61 = vmax.f32 %v1391_v57, 0.0 }
 0x24a   : > { %v1455_v0 = vmax.f32 %v1383_v59, 0.0 }
 0x24b   : > { %v1489_v1 = vpack.c.bf16 %v1457_v61, %v1456_v60 }
 0x24c   : > { %v1488_v3 = vpack.c.bf16 %v1455_v0, %v1454_v62 }
 0x24e   : > { %2436 = vmatprep.mubr.bf16.mxu0 %v1488_v3 }
 0x24f   : > { %2437 = vmatmul.mubr.bf16.gmra.mrb[92].mxu0 %v1489_v1 }
 0x2aa   : > { %v2378_v6 = vpop.f32.mrb[32].mxu0 }
 0x2ab   : > { %v1604_v8 = vadd.f32 %v2378_v6, %v2991_v5  ;;  %v1595_v42 = vpop.f32.mrb[33].mxu0 }
 0x2ac   : > { %v1596_v9 = vadd.f32 %v2991_v5, %v1595_v42  ;;  %v2379_v10 = vpop.f32.mrb[34].mxu0 }
 0x2ad   : > { %1852 = vst [vmem:[%s2995_s8 + $0x10] sm:$0xff] %v1604_v8  ;;  %v1607_v11 = vadd.f32 %v2379_v10, %v2991_v5  ;;  %v1598_v12 = vpop.f32.mrb[35].mxu0 }
 0x2ae   : > { %1850 = vst [vmem:[%s2995_s8] sm:$0xff] %v1596_v9  ;;  %v1599_v13 = vadd.f32 %v2991_v5, %v1598_v12 }
 0x2af   : > { %1853 = vst [vmem:[%s2995_s8 + $0x18] sm:$0xff] %v1607_v11 }
 0x2b0   : > { %1851 = vst [vmem:[%s2995_s8 + $0x8] sm:$0xff] %v1599_v13 }
 0x2b2   : > { %v2382_v14 = vpop.f32.mrb[36].mxu0 }
 0x2b3   : > { %v1620_v15 = vadd.f32 %v2382_v14, %v2991_v5  ;;  %v1611_v16 = vpop.f32.mrb[37].mxu0 }
 0x2b4   : > { %v1612_v17 = vadd.f32 %v2991_v5, %v1611_v16  ;;  %v2383_v18 = vpop.f32.mrb[38].mxu0 }
 0x2b5   : > { %1856 = vst [vmem:[%s2995_s8 + $0x30] sm:$0xff] %v1620_v15  ;;  %v1623_v19 = vadd.f32 %v2383_v18, %v2991_v5  ;;  %v1614_v20 = vpop.f32.mrb[39].mxu0 }
 0x2b6   : > { %1854 = vst [vmem:[%s2995_s8 + $0x20] sm:$0xff] %v1612_v17  ;;  %v1615_v21 = vadd.f32 %v2991_v5, %v1614_v20 }
 0x2b7   : > { %1857 = vst [vmem:[%s2995_s8 + $0x38] sm:$0xff] %v1623_v19 }
 0x2b8   : > { %1855 = vst [vmem:[%s2995_s8 + $0x28] sm:$0xff] %v1615_v21 }
 0x2ba   : > { %v2386_v22 = vpop.f32.mrb[40].mxu0 }
 0x2bb   : > { %v1636_v23 = vadd.f32 %v2386_v22, %v2991_v5  ;;  %v1627_v24 = vpop.f32.mrb[41].mxu0 }
 0x2bc   : > { %v1628_v25 = vadd.f32 %v2991_v5, %v1627_v24  ;;  %v2387_v43 = vpop.f32.mrb[42].mxu0 }
 0x2bd   : > { %1860 = vst [vmem:[%s2995_s8 + $0x50] sm:$0xff] %v1636_v23  ;;  %v1639_v26 = vadd.f32 %v2387_v43, %v2991_v5  ;;  %v1630_v27 = vpop.f32.mrb[43].mxu0 }
 0x2be   : > { %1858 = vst [vmem:[%s2995_s8 + $0x40] sm:$0xff] %v1628_v25  ;;  %v1631_v28 = vadd.f32 %v2991_v5, %v1630_v27 }
 0x2bf   : > { %1861 = vst [vmem:[%s2995_s8 + $0x58] sm:$0xff] %v1639_v26 }
 0x2c0   : > { %1859 = vst [vmem:[%s2995_s8 + $0x48] sm:$0xff] %v1631_v28 }
 0x2c2   : > { %v2390_v30 = vpop.f32.mrb[44].mxu0 }
 0x2c3   : > { %v1652_v31 = vadd.f32 %v2390_v30, %v2991_v5  ;;  %v1643_v34 = vpop.f32.mrb[45].mxu0 }
 0x2c4   : > { %v1644_v38 = vadd.f32 %v2991_v5, %v1643_v34  ;;  %v2391_v4 = vpop.f32.mrb[46].mxu0 }
 0x2c5   : > { %1864 = vst [vmem:[%s2995_s8 + $0x70] sm:$0xff] %v1652_v31  ;;  %v1655_v7 = vadd.f32 %v2391_v4, %v2991_v5  ;;  %v1646_v32 = vpop.f32.mrb[47].mxu0 }
 0x2c6   : > { %1862 = vst [vmem:[%s2995_s8 + $0x60] sm:$0xff] %v1644_v38  ;;  %v1647_v35 = vadd.f32 %v2991_v5, %v1646_v32 }
 0x2c7   : > { %1865 = vst [vmem:[%s2995_s8 + $0x78] sm:$0xff] %v1655_v7 }
 0x2c8   : > { %1863 = vst [vmem:[%s2995_s8 + $0x68] sm:$0xff] %v1647_v35 }
 0x2ca   : > { %v2394_v63 = vpop.f32.mrb[48].mxu0 }
 0x2cb   : > { %v1668_v2 = vadd.f32 %v2394_v63, %v2991_v5  ;;  %v1659_v29 = vpop.f32.mrb[49].mxu0 }
 0x2cc   : > { %v1660_v33 = vadd.f32 %v2991_v5, %v1659_v29  ;;  %v2395_v36 = vpop.f32.mrb[50].mxu0 }
 0x2cd   : > { %1868 = vst [vmem:[%s2995_s8 + $0x90] sm:$0xff] %v1668_v2  ;;  %v1671_v37 = vadd.f32 %v2395_v36, %v2991_v5  ;;  %v1662_v39 = vpop.f32.mrb[51].mxu0 }
 0x2ce   : > { %1866 = vst [vmem:[%s2995_s8 + $0x80] sm:$0xff] %v1660_v33  ;;  %v1663_v40 = vadd.f32 %v2991_v5, %v1662_v39 }
 0x2cf   : > { %1869 = vst [vmem:[%s2995_s8 + $0x98] sm:$0xff] %v1671_v37 }
 0x2d0   : > { %1867 = vst [vmem:[%s2995_s8 + $0x88] sm:$0xff] %v1663_v40 }
 0x2d2   : > { %v2398_v41 = vpop.f32.mrb[52].mxu0 }
 0x2d3   : > { %v1684_v44 = vadd.f32 %v2398_v41, %v2991_v5  ;;  %v1675_v45 = vpop.f32.mrb[53].mxu0 }
 0x2d4   : > { %v1676_v46 = vadd.f32 %v2991_v5, %v1675_v45  ;;  %v2399_v47 = vpop.f32.mrb[54].mxu0 }
 0x2d5   : > { %1872 = vst [vmem:[%s2995_s8 + $0xb0] sm:$0xff] %v1684_v44  ;;  %v1687_v48 = vadd.f32 %v2399_v47, %v2991_v5  ;;  %v1678_v49 = vpop.f32.mrb[55].mxu0 }
 0x2d6   : > { %1870 = vst [vmem:[%s2995_s8 + $0xa0] sm:$0xff] %v1676_v46  ;;  %v1679_v50 = vadd.f32 %v2991_v5, %v1678_v49 }
 0x2d7   : > { %1873 = vst [vmem:[%s2995_s8 + $0xb8] sm:$0xff] %v1687_v48 }
 0x2d8   : > { %1871 = vst [vmem:[%s2995_s8 + $0xa8] sm:$0xff] %v1679_v50 }
 0x2da   : > { %v2402_v51 = vpop.f32.mrb[56].mxu0 }
 0x2db   : > { %v1700_v52 = vadd.f32 %v2402_v51, %v2991_v5  ;;  %v1691_v53 = vpop.f32.mrb[57].mxu0 }
 0x2dc   : > { %v1692_v54 = vadd.f32 %v2991_v5, %v1691_v53  ;;  %v2403_v55 = vpop.f32.mrb[58].mxu0 }
 0x2dd   : > { %1876 = vst [vmem:[%s2995_s8 + $0xd0] sm:$0xff] %v1700_v52  ;;  %v1703_v56 = vadd.f32 %v2403_v55, %v2991_v5  ;;  %v1694_v57 = vpop.f32.mrb[59].mxu0 }
 0x2de   : > { %1874 = vst [vmem:[%s2995_s8 + $0xc0] sm:$0xff] %v1692_v54  ;;  %v1695_v58 = vadd.f32 %v2991_v5, %v1694_v57 }
 0x2df   : > { %1877 = vst [vmem:[%s2995_s8 + $0xd8] sm:$0xff] %v1703_v56 }
 0x2e0   : > { %1875 = vst [vmem:[%s2995_s8 + $0xc8] sm:$0xff] %v1695_v58 }
 0x2e2   : > { %v2406_v59 = vpop.f32.mrb[60].mxu0 }
 0x2e3   : > { %v1716_v60 = vadd.f32 %v2406_v59, %v2991_v5  ;;  %v1707_v61 = vpop.f32.mrb[61].mxu0 }
 0x2e4   : > { %v1708_v62 = vadd.f32 %v2991_v5, %v1707_v61  ;;  %v2407_v0 = vpop.f32.mrb[62].mxu0 }
 0x2e5   : > { %1880 = vst [vmem:[%s2995_s8 + $0xf0] sm:$0xff] %v1716_v60  ;;  %v1719_v1 = vadd.f32 %v2407_v0, %v2991_v5  ;;  %v1710_v3 = vpop.f32.mrb[63].mxu0 }
 0x2e6   : > { %1878 = vst [vmem:[%s2995_s8 + $0xe0] sm:$0xff] %v1708_v62  ;;  %v1711_v6 = vadd.f32 %v2991_v5, %v1710_v3 }
 0x2e7   : > { %1881 = vst [vmem:[%s2995_s8 + $0xf8] sm:$0xff] %v1719_v1 }
 0x2e8   : > { %1879 = vst [vmem:[%s2995_s8 + $0xe8] sm:$0xff] %v1711_v6 }
 0x2ea   : > { %v2410_v8 = vpop.f32.mrb[64].mxu0 }
 0x2eb   : > { %v1732_v42 = vadd.f32 %v2410_v8, %v2991_v5  ;;  %v1723_v9 = vpop.f32.mrb[65].mxu0 }
 0x2ec   : > { %v1724_v10 = vadd.f32 %v2991_v5, %v1723_v9  ;;  %v2411_v11 = vpop.f32.mrb[66].mxu0 }
 0x2ed   : > { %1884 = vst [vmem:[%s2995_s8 + $0x110] sm:$0xff] %v1732_v42  ;;  %v1735_v12 = vadd.f32 %v2411_v11, %v2991_v5  ;;  %v1726_v13 = vpop.f32.mrb[67].mxu0 }
 0x2ee   : > { %1882 = vst [vmem:[%s2995_s8 + $0x100] sm:$0xff] %v1724_v10  ;;  %v1727_v14 = vadd.f32 %v2991_v5, %v1726_v13 }
 0x2ef   : > { %1885 = vst [vmem:[%s2995_s8 + $0x118] sm:$0xff] %v1735_v12 }
 0x2f0   : > { %1883 = vst [vmem:[%s2995_s8 + $0x108] sm:$0xff] %v1727_v14 }
 0x2f2   : > { %v2414_v15 = vpop.f32.mrb[68].mxu0 }
 0x2f3   : > { %v1748_v16 = vadd.f32 %v2414_v15, %v2991_v5  ;;  %v1739_v17 = vpop.f32.mrb[69].mxu0 }
 0x2f4   : > { %v1740_v18 = vadd.f32 %v2991_v5, %v1739_v17  ;;  %v2415_v19 = vpop.f32.mrb[70].mxu0 }
 0x2f5   : > { %1888 = vst [vmem:[%s2995_s8 + $0x130] sm:$0xff] %v1748_v16  ;;  %v1751_v20 = vadd.f32 %v2415_v19, %v2991_v5  ;;  %v1742_v21 = vpop.f32.mrb[71].mxu0 }
 0x2f6   : > { %1886 = vst [vmem:[%s2995_s8 + $0x120] sm:$0xff] %v1740_v18  ;;  %v1743_v22 = vadd.f32 %v2991_v5, %v1742_v21 }
 0x2f7   : > { %1889 = vst [vmem:[%s2995_s8 + $0x138] sm:$0xff] %v1751_v20 }
 0x2f8   : > { %1887 = vst [vmem:[%s2995_s8 + $0x128] sm:$0xff] %v1743_v22 }
 0x2fa   : > { %v2418_v23 = vpop.f32.mrb[72].mxu0 }
 0x2fb   : > { %v1764_v24 = vadd.f32 %v2418_v23, %v2991_v5  ;;  %v1755_v25 = vpop.f32.mrb[73].mxu0 }
 0x2fc   : > { %v1756_v43 = vadd.f32 %v2991_v5, %v1755_v25  ;;  %v2419_v26 = vpop.f32.mrb[74].mxu0 }
 0x2fd   : > { %1892 = vst [vmem:[%s2995_s8 + $0x150] sm:$0xff] %v1764_v24  ;;  %v1767_v27 = vadd.f32 %v2419_v26, %v2991_v5  ;;  %v1758_v28 = vpop.f32.mrb[75].mxu0 }
 0x2fe   : > { %1890 = vst [vmem:[%s2995_s8 + $0x140] sm:$0xff] %v1756_v43  ;;  %v1759_v30 = vadd.f32 %v2991_v5, %v1758_v28 }
 0x2ff   : > { %1893 = vst [vmem:[%s2995_s8 + $0x158] sm:$0xff] %v1767_v27 }
 0x300   : > { %1891 = vst [vmem:[%s2995_s8 + $0x148] sm:$0xff] %v1759_v30 }
 0x302   : > { %v2422_v31 = vpop.f32.mrb[76].mxu0 }
 0x303   : > { %v1780_v34 = vadd.f32 %v2422_v31, %v2991_v5  ;;  %v1771_v38 = vpop.f32.mrb[77].mxu0 }
 0x304   : > { %v1772_v4 = vadd.f32 %v2991_v5, %v1771_v38  ;;  %v2423_v7 = vpop.f32.mrb[78].mxu0 }
 0x305   : > { %1896 = vst [vmem:[%s2995_s8 + $0x170] sm:$0xff] %v1780_v34  ;;  %v1783_v32 = vadd.f32 %v2423_v7, %v2991_v5  ;;  %v1774_v35 = vpop.f32.mrb[79].mxu0 }
 0x306   : > { %1894 = vst [vmem:[%s2995_s8 + $0x160] sm:$0xff] %v1772_v4  ;;  %v1775_v63 = vadd.f32 %v2991_v5, %v1774_v35 }
 0x307   : > { %1897 = vst [vmem:[%s2995_s8 + $0x178] sm:$0xff] %v1783_v32 }
 0x308   : > { %1895 = vst [vmem:[%s2995_s8 + $0x168] sm:$0xff] %v1775_v63 }
 0x30a   : > { %v2426_v2 = vpop.f32.mrb[80].mxu0 }
 0x30b   : > { %v1796_v29 = vadd.f32 %v2426_v2, %v2991_v5  ;;  %v1787_v33 = vpop.f32.mrb[81].mxu0 }
 0x30c   : > { %v1788_v36 = vadd.f32 %v2991_v5, %v1787_v33  ;;  %v2427_v37 = vpop.f32.mrb[82].mxu0 }
 0x30d   : > { %1900 = vst [vmem:[%s2995_s8 + $0x190] sm:$0xff] %v1796_v29  ;;  %v1799_v39 = vadd.f32 %v2427_v37, %v2991_v5  ;;  %v1790_v40 = vpop.f32.mrb[83].mxu0 }
 0x30e   : > { %1898 = vst [vmem:[%s2995_s8 + $0x180] sm:$0xff] %v1788_v36  ;;  %v1791_v41 = vadd.f32 %v2991_v5, %v1790_v40 }
 0x30f   : > { %1901 = vst [vmem:[%s2995_s8 + $0x198] sm:$0xff] %v1799_v39 }
 0x310   : > { %1899 = vst [vmem:[%s2995_s8 + $0x188] sm:$0xff] %v1791_v41 }
 0x312   : > { %v2430_v44 = vpop.f32.mrb[84].mxu0 }
 0x313   : > { %v1812_v45 = vadd.f32 %v2430_v44, %v2991_v5  ;;  %v1803_v46 = vpop.f32.mrb[85].mxu0 }
 0x314   : > { %v1804_v47 = vadd.f32 %v2991_v5, %v1803_v46  ;;  %v2431_v48 = vpop.f32.mrb[86].mxu0 }
 0x315   : > { %1904 = vst [vmem:[%s2995_s8 + $0x1b0] sm:$0xff] %v1812_v45  ;;  %v1815_v49 = vadd.f32 %v2431_v48, %v2991_v5  ;;  %v1806_v50 = vpop.f32.mrb[87].mxu0 }
 0x316   : > { %1902 = vst [vmem:[%s2995_s8 + $0x1a0] sm:$0xff] %v1804_v47  ;;  %v1807_v51 = vadd.f32 %v2991_v5, %v1806_v50 }
 0x317   : > { %1905 = vst [vmem:[%s2995_s8 + $0x1b8] sm:$0xff] %v1815_v49 }
 0x318   : > { %1903 = vst [vmem:[%s2995_s8 + $0x1a8] sm:$0xff] %v1807_v51 }
 0x31a   : > { %v2434_v52 = vpop.f32.mrb[88].mxu0 }
 0x31b   : > { %v1828_v53 = vadd.f32 %v2434_v52, %v2991_v5  ;;  %v1819_v54 = vpop.f32.mrb[89].mxu0 }
 0x31c   : > { %v1820_v55 = vadd.f32 %v2991_v5, %v1819_v54  ;;  %v2435_v56 = vpop.f32.mrb[90].mxu0 }
 0x31d   : > { %1908 = vst [vmem:[%s2995_s8 + $0x1d0] sm:$0xff] %v1828_v53  ;;  %v1831_v57 = vadd.f32 %v2435_v56, %v2991_v5  ;;  %v1822_v58 = vpop.f32.mrb[91].mxu0 }
 0x31e   : > { %1906 = vst [vmem:[%s2995_s8 + $0x1c0] sm:$0xff] %v1820_v55  ;;  %v1823_v59 = vadd.f32 %v2991_v5, %v1822_v58 }
 0x31f   : > { %1909 = vst [vmem:[%s2995_s8 + $0x1d8] sm:$0xff] %v1831_v57 }
 0x320   : > { %1907 = vst [vmem:[%s2995_s8 + $0x1c8] sm:$0xff] %v1823_v59 }
 0x322   : > { %v2438_v60 = vpop.f32.mrb[92].mxu0  ;;  %1921 = sbr.rel (!%p2679_p5) target bundleno = 837 (0x345), region = 52 }
 0x323   : > { %v1844_v61 = vadd.f32 %v2438_v60, %v2991_v5  ;;  %v1835_v62 = vpop.f32.mrb[93].mxu0 }
 0x324   : > { %v1836_v0 = vadd.f32 %v2991_v5, %v1835_v62  ;;  %v2439_v1 = vpop.f32.mrb[94].mxu0 }
 0x325   : > { %1912 = vst [vmem:[%s2995_s8 + $0x1f0] sm:$0xff] %v1844_v61  ;;  %v1847_v3 = vadd.f32 %v2439_v1, %v2991_v5  ;;  %v1838_v6 = vpop.f32.mrb[95].mxu0 }
 0x326   : > { %1910 = vst [vmem:[%s2995_s8 + $0x1e0] sm:$0xff] %v1836_v0  ;;  %v1839_v8 = vadd.f32 %v2991_v5, %v1838_v6 }
 0x327   : > { %1913 = vst [vmem:[%s2995_s8 + $0x1f8] sm:$0xff] %v1847_v3 }
 0x328   : > { %1911 = vst [vmem:[%s2995_s8 + $0x1e8] sm:$0xff] %v1839_v8 }
 0x329   : > { %s3201_s13 = smov (!%p1924_p11, %s1923_s13), 64 }
 0x32a   : > { %s3130_s14 = sshll.u32 %s3201_s13, 7 }
 0x32b   : > { %s1928_s29 = ssub.s32 8192, %s3130_s14 }
 0x32c   : > { %1929 = vsyncadd %s3125_s9, %s1928_s29  ;;  %p2091_p12 = scmp.ne.s32.totalorder %s3130_s14, 0  ;;  %s2097_s16 = sshll.u32 %s2662_s28, 13 }
 0x32d   : > { %s3139_s18 = scalar_lea.hbm %s3193_s7, %s2097_s16  ;;  %s1934_s15 = sshll.u32 %s2995_s8, 4  ;;  %s3142_s15 = int_to_ptr.vmem [resolvable:$true] %s1934_s15 }
 0x32e   : > { %s2534_s19 = scalar_lea.vmem %s3142_s15, %s3130_s14  ;;  %s2598_s20 = smov [#allocation2]  }
 0x32f   : > { %p2535_p13 = scmp.ne.s32.totalorder %s3142_s15, %s2534_s19  ;;  %s2538_s21 = sshll.u32 %s2598_s20, 4  ;;  %s2539_s21 = int_to_ptr.vmem [resolvable:$false] %s2538_s21 }
 0x330   : > { %s2540_s28 = scalar_lea.vmem %s2539_s21, 16384  ;;  %p2541_p2 = scmp.lt.s32.totalorder %s3142_s15, %s2539_s21 }
 0x331   : > { %p2536_p0 = pnand %p2535_p13, %p2091_p12  ;;  %p2542_p3 = scmp.lt.s32.totalorder %s2540_s28, %s2534_s19 }
 0x333   : > { %p2537_p1 = pneg %p2536_p0  ;;  %p2543_p4 = por %p2542_p3, %p2541_p2 }
 0x335   : > { %p2544_p5 = pnand %p2543_p4, %p2537_p1 }
 0x337   : > { %2547 = shalt.err (!%p2544_p5)
}
 0x338   : > { %s2548_s22 = scalar_lea.hbm %s3139_s18, %s3130_s14  ;;  %s2552_s13 = scalar_lea.hbm %s3193_s7, 10240 }
 0x339   : > { %p2549_p7 = scmp.ne.s32.totalorder %s3139_s18, %s2548_s22  ;;  %p2553_p10 = scmp.lt.u32.totalorder %s3139_s18, %s3193_s7 }
 0x33a   : > { %p2554_p11 = scmp.lt.u32.totalorder %s2552_s13, %s2548_s22  ;;  %p2556_p0 = scmp.lt.u32.totalorder %s2548_s22, %s3139_s18 }
 0x33b   : > { %p2550_p8 = pnand %p2549_p7, %p2091_p12 }
 0x33c   : > { %p2555_p13 = por %p2554_p11, %p2553_p10 }
 0x33d   : > { %p2551_p9 = pneg %p2550_p8 }
 0x33e   : > { %p2557_p1 = por %p2556_p0, %p2555_p13 }
 0x340   : > { %p2558_p2 = pnand %p2557_p1, %p2551_p9 }
 0x342   : > { %2561 = shalt.err (!%p2558_p2)
}
 0x343   : > { %s2599_s17 = smov 128   ;;  %s2600_s11 = smov 8  }
 0x344   : > { %1940 = dma.vmem_to_hbm [thread:$0]  (%p2091_p12), %s3142_s15, %s3130_s14, %s3139_s18, %s3125_s9, %s2599_s17, %s2599_s17, %s2600_s11  }
 0x345 PF: > { %p2449_p3 = scmp.ge.s32.totalorder %s2596_s27, 2  ;;  %s1949_s19 = sand.u32 1, %s2584_s24  }
 0x346   : > { %s1950_s20 = scalar_lea.sflag [#allocation3], %s1949_s19 }
 0x347   : > { %p2446_p4 = pnand %p2449_p3, %p2683_p6 }
 0x349   : > { %2579 = dma.done.wait (!%p2446_p4), %s1950_s20, 8192  }
 0x34a   : > { %2581 = vsyncadd (!%p2446_p4), %s1950_s20, 4294959104  ;;  %p17_p5 = scmp.ge.s32.totalorder %s2666_s30, 4   ;;  %s3196_s24 = smov %s2588_s25 }
 0x34b   : > { %s3197_s25 = smov %s2592_s26  ;;  %s3198_s26 = smov %s2677_s10 }
 0x34c   : > { %s3199_s27 = smov %s2666_s30  ;;  %19 = sbr.rel (!%p17_p5) target bundleno = 3 (0x3), region = 83 }
 0x353   :  { %1955 = vsyncpa [#allocation3], 1 }
 0x354   :  { %1957 = vsyncpa [#allocation3 + $0x1], 1 }

</bundles_post_ra>
